<compile_context>
chip_gen: v6e
topology: v6e:2x2x1
jax: 0.10.0
libtpu: 0.0.40
codegen_flags: <defaults>
</compile_context>

<pallas_src>
import jax
import jax.numpy as jnp
from jax.experimental import pallas as pl
from jax.experimental.pallas import tpu as pltpu

# ---- Small synthetic config (mirrors Training_Config fields used in __init__) ----
VOCAB_SIZE = 100
WORD_DIM   = 16
POS_DIM    = 8
POS_LIMIT  = 10
POS_VOCAB  = POS_LIMIT * 2 + 2 + 1       # 23
FILTER_NUM = 16
HIDDEN     = FILTER_NUM * 3              # conv out channels = 48
C_IN       = WORD_DIM + 2 * POS_DIM      # 32
KSIZE      = 3
LABEL_NUM  = 5
MAX_LEN    = 16                          # max_sentence_length (pool window)
MINUS      = -100.0                      # same piecewise-mask constant as PyTorch

MASK_TABLE = jnp.array([[0., 0., 0.],
                        [1., 0., 0.],
                        [0., 1., 0.],
                        [0., 0., 1.]], dtype=jnp.float32)


def _round_up(x, m):
    return (x + m - 1) // m * m


def pcnn_kernel(x_ref, mask_ref, wc_ref, bc_ref, wo_ref, bo_ref, o_ref):
    """One batch tile of the PCNN hot path.

    x_ref   : (L+2, BT, C_IN)  bf16 zero-padded embeddings, length-major
    mask_ref: (L, BT, 1)       int32 segment ids (0 = padding, 1/2/3 = pieces)
    wc_ref  : (3*C_IN, HIDDEN) bf16 conv weight, tap-major rows
    bc_ref  : (1, HIDDEN)      f32 conv bias
    wo_ref  : (3, HIDDEN, LABEL_NUM) f32 output weight split per pooled segment
    bo_ref  : (1, LABEL_NUM)   f32 output bias
    o_ref   : (BT, LABEL_NUM)  f32 logits for this tile
    """
    L = mask_ref.shape[0]
    bt = x_ref.shape[1]
    cin = x_ref.shape[2]
    hidden = wc_ref.shape[1]

    xp = x_ref[...]                                              # (L+2, BT, C_IN) bf16
    # im2col over the free leading axis -> one K=3*C_IN MXU matmul.
    lhs = jnp.concatenate([xp[0:L], xp[1:L + 1], xp[2:L + 2]], axis=-1)  # (L, BT, 3*C_IN)
    conv = jnp.dot(lhs.reshape(L * bt, KSIZE * cin), wc_ref[...],
                   preferred_element_type=jnp.float32)           # (L*BT, HIDDEN) f32
    conv = conv.reshape(L, bt, hidden) + bc_ref[...]             # bias add once per tile

    m = mask_ref[...]                                            # (L, BT, 1) int32
    logits = None
    for s in range(3):
        pen = jnp.where(m == s + 1, 0.0, MINUS)                  # (L, BT, 1) f32
        h = jnp.maximum(conv + pen, 0.0)                         # piecewise masked ReLU
        pooled = jnp.max(h, axis=0)                              # max-pool over L -> (BT, HIDDEN)
        part = jnp.dot(pooled, wo_ref[s],
                       preferred_element_type=jnp.float32)       # (BT, LABEL_NUM)
        logits = part if logits is None else logits + part       # avoids 3*HIDDEN lane concat
    # TODO(synk): dropout is identity at inference; no in-kernel RNG needed.
    o_ref[...] = logits + bo_ref[...]


def init_params(key):
    ks = jax.random.split(key, 7)
    p = {
        "word_emb": 0.1 * jax.random.normal(ks[0], (VOCAB_SIZE, WORD_DIM), jnp.float32),
        "pos1_emb": 0.1 * jax.random.normal(ks[1], (POS_VOCAB, POS_DIM), jnp.float32),
        "pos2_emb": 0.1 * jax.random.normal(ks[2], (POS_VOCAB, POS_DIM), jnp.float32),
        # conv weight stored tap-major: (K, C_IN, HIDDEN)  (PyTorch is (HIDDEN, C_IN, K))
        "conv_w": 0.1 * jax.random.normal(ks[3], (KSIZE, C_IN, HIDDEN), jnp.float32),
        "conv_b": 0.1 * jax.random.normal(ks[4], (1, HIDDEN), jnp.float32),
        # linear stored (in, out)  (PyTorch is (out, in))
        "out_w": 0.1 * jax.random.normal(ks[5], (3 * HIDDEN, LABEL_NUM), jnp.float32),
        "out_b": 0.1 * jax.random.normal(ks[6], (1, LABEL_NUM), jnp.float32),
    }
    return p


def pcnn_forward(token, pos1, pos2, mask, params, *, b_tile=128):
    """token/pos1/pos2/mask: (B, L) int32.  Returns (B, LABEL_NUM) f32 logits."""
    B, L = token.shape

    # --- glue: embedding gathers + concat + conv zero-padding -----------------
    # TODO(synk): fuse the gather in-kernel (scalar-prefetched ids + VMEM-resident
    # tables) to avoid materializing the activations to HBM entirely.
    x = jnp.concatenate([params["word_emb"][token],
                         params["pos1_emb"][pos1],
                         params["pos2_emb"][pos2]], axis=-1)        # (B, L, C_IN) f32
    x = x.astype(jnp.bfloat16)                                      # halve HBM bytes; f32 accum in-kernel
    x = jnp.pad(x, ((0, 0), (1, 1), (0, 0)))                        # Conv1d padding=1

    # Batch tiling: BT a multiple of 16 (bf16 sublane packing); pad B up to it.
    bt = min(b_tile, _round_up(B, 16))
    Bp = _round_up(B, bt)
    if Bp != B:                                                     # dummy rows: mask=0, sliced off below
        x = jnp.pad(x, ((0, Bp - B), (0, 0), (0, 0)))
        mask = jnp.pad(mask, ((0, Bp - B), (0, 0)))

    x_t = jnp.transpose(x, (1, 0, 2))                               # (L+2, Bp, C_IN) length-major
    mask_t = jnp.transpose(mask, (1, 0))[:, :, None].astype(jnp.int32)  # (L, Bp, 1)

    wc2d = params["conv_w"].reshape(KSIZE * C_IN, HIDDEN).astype(jnp.bfloat16)
    wo3 = params["out_w"].reshape(3, HIDDEN, LABEL_NUM)

    out = pl.pallas_call(
        pcnn_kernel,
        out_shape=jax.ShapeDtypeStruct((Bp, LABEL_NUM), jnp.float32),
        grid_spec=pltpu.PrefetchScalarGridSpec(
            num_scalar_prefetch=0,
            grid=(Bp // bt,),
            in_specs=[
                pl.BlockSpec((L + 2, bt, C_IN),      lambda b: (0, b, 0)),
                pl.BlockSpec((L, bt, 1),             lambda b: (0, b, 0)),
                pl.BlockSpec((KSIZE * C_IN, HIDDEN), lambda b: (0, 0)),
                pl.BlockSpec((1, HIDDEN),            lambda b: (0, 0)),
                pl.BlockSpec((3, HIDDEN, LABEL_NUM), lambda b: (0, 0, 0)),
                pl.BlockSpec((1, LABEL_NUM),         lambda b: (0, 0)),
            ],
            out_specs=pl.BlockSpec((bt, LABEL_NUM), lambda b: (b, 0)),
        ),
        # Parallel batch-tile grid (megacore sharding on v7x).  Raise b_tile +
        # vmem_limit_bytes for very large batches if desired; bt=128 fits the
        # default scoped VMEM on v5e/v6e/v7x.
        compiler_params=pltpu.CompilerParams(dimension_semantics=("parallel",)),
    )(x_t, mask_t, wc2d, params["conv_b"], wo3, params["out_b"])
    return out[:B]


def reference_forward(token, pos1, pos2, mask, params):
    """Pure-JAX mirror of the PyTorch forward (bf16-quantized inputs/conv weight
    to match the kernel's MXU dtype; all accumulation in f32)."""
    x = jnp.concatenate([params["word_emb"][token],
                         params["pos1_emb"][pos1],
                         params["pos2_emb"][pos2]], axis=-1)        # (B, L, C_IN)
    x = x.astype(jnp.bfloat16).astype(jnp.float32)
    w = params["conv_w"].astype(jnp.bfloat16).astype(jnp.float32)
    x_ncw = jnp.transpose(x, (0, 2, 1))                             # (B, C_IN, L)
    w_oik = jnp.transpose(w, (2, 1, 0))                             # (HIDDEN, C_IN, K)
    conv = jax.lax.conv_general_dilated(
        x_ncw, w_oik, window_strides=(1,), padding=[(1, 1)],
        dimension_numbers=("NCH", "OIH", "NCH"),
        precision=jax.lax.Precision.HIGHEST)                        # (B, HIDDEN, L)
    conv = conv + params["conv_b"].reshape(1, HIDDEN, 1)
    m = 1.0 - jnp.transpose(MASK_TABLE[mask], (0, 2, 1))            # (B, 3, L)
    pools = []
    for s in range(3):
        h = jax.nn.relu(conv + MINUS * m[:, s:s + 1, :])
        pools.append(jnp.max(h, axis=2))                            # (B, HIDDEN)
    f = jnp.concatenate(pools, axis=1)                              # (B, 3*HIDDEN)
    return (jnp.dot(f, params["out_w"], precision=jax.lax.Precision.HIGHEST)
            + params["out_b"].reshape(1, -1))


if __name__ == "__main__":
    key = jax.random.PRNGKey(0)
    kp, kt, k1, k2, km = jax.random.split(key, 5)
    params = init_params(kp)

    B, L = 2, MAX_LEN
    token = jax.random.randint(kt, (B, L), 0, VOCAB_SIZE, dtype=jnp.int32)
    pos1  = jax.random.randint(k1, (B, L), 0, POS_VOCAB, dtype=jnp.int32)
    pos2  = jax.random.randint(k2, (B, L), 0, POS_VOCAB, dtype=jnp.int32)
    mask  = jax.random.randint(km, (B, L), 0, 4, dtype=jnp.int32)   # 0=pad, 1/2/3=segments

    out = jax.jit(pcnn_forward)(token, pos1, pos2, mask, params)
    out = jax.block_until_ready(out)

    ref = reference_forward(token, pos1, pos2, mask, params)
    assert out.shape == (B, LABEL_NUM)
    assert jnp.allclose(out, ref, atol=2e-3, rtol=2e-3), (out, ref)
    print("KERNEL_OK")
</pallas_src>

<mosaic_0001>
module attributes {stable_mosaic.version = 11 : i64} {
  func.func @pcnn_kernel(%arg0: i32, %arg1: memref<18x16x32xbf16, #tpu.memory_space<vmem>>, %arg2: memref<16x16x1xi32, #tpu.memory_space<vmem>>, %arg3: memref<96x48xbf16, #tpu.memory_space<vmem>>, %arg4: memref<1x48xf32, #tpu.memory_space<vmem>>, %arg5: memref<3x48x5xf32, #tpu.memory_space<vmem>>, %arg6: memref<1x5xf32, #tpu.memory_space<vmem>>, %arg7: memref<16x5xf32, #tpu.memory_space<vmem>>) attributes {dimension_semantics = [#tpu.dimension_semantics<parallel>], iteration_bounds = array<i64: 1>, scalar_prefetch = 0 : i64, scratch_operands = 0 : i64, tpu.core_type = #tpu.core_type<tc>, window_params = [{transform_indices = @transform_0, window_bounds = array<i64: 18, 16, 32>}, {transform_indices = @transform_1, window_bounds = array<i64: 16, 16, 1>}, {pipeline_mode = #tpu.pipeline_mode<synchronous>, transform_indices = @transform_2, window_bounds = array<i64: 96, 48>}, {pipeline_mode = #tpu.pipeline_mode<synchronous>, transform_indices = @transform_3, window_bounds = array<i64: 1, 48>}, {pipeline_mode = #tpu.pipeline_mode<synchronous>, transform_indices = @transform_4, window_bounds = array<i64: 3, 48, 5>}, {pipeline_mode = #tpu.pipeline_mode<synchronous>, transform_indices = @transform_5, window_bounds = array<i64: 1, 5>}, {transform_indices = @transform_6, window_bounds = array<i64: 16, 5>}]} {
    %c0 = arith.constant 0 : index
    %c0_0 = arith.constant 0 : index
    %c0_1 = arith.constant 0 : index
    %0 = vector.load %arg1[%c0, %c0_0, %c0_1] : memref<18x16x32xbf16, #tpu.memory_space<vmem>>, vector<18x16x32xbf16>
    %1 = vector.extract_strided_slice %0 {offsets = [0, 0, 0], sizes = [16, 16, 32], strides = [1, 1, 1]} : vector<18x16x32xbf16> to vector<16x16x32xbf16>
    %2 = vector.extract_strided_slice %0 {offsets = [1, 0, 0], sizes = [16, 16, 32], strides = [1, 1, 1]} : vector<18x16x32xbf16> to vector<16x16x32xbf16>
    %3 = vector.extract_strided_slice %0 {offsets = [2, 0, 0], sizes = [16, 16, 32], strides = [1, 1, 1]} : vector<18x16x32xbf16> to vector<16x16x32xbf16>
    %4 = tpu.concatenate %1, %2, %3 in 2 : vector<16x16x32xbf16>, vector<16x16x32xbf16>, vector<16x16x32xbf16> -> vector<16x16x96xbf16>
    %5 = vector.shape_cast %4 : vector<16x16x96xbf16> to vector<256x96xbf16>
    %c0_2 = arith.constant 0 : index
    %c0_3 = arith.constant 0 : index
    %6 = vector.load %arg3[%c0_2, %c0_3] : memref<96x48xbf16, #tpu.memory_space<vmem>>, vector<96x48xbf16>
    %cst = arith.constant dense<0.000000e+00> : vector<256x48xf32>
    %7 = tpu.matmul %5, %6, %cst {dimension_numbers = #tpu.dot_dimension_numbers<[1], [0], [0], [1], [0, 0, 1, 1], [], []>} : vector<256x96xbf16>, vector<96x48xbf16>, vector<256x48xf32> -> vector<256x48xf32>
    %8 = vector.shape_cast %7 : vector<256x48xf32> to vector<16x16x48xf32>
    %c0_4 = arith.constant 0 : index
    %c0_5 = arith.constant 0 : index
    %9 = vector.load %arg4[%c0_4, %c0_5] : memref<1x48xf32, #tpu.memory_space<vmem>>, vector<1x48xf32>
    %10 = vector.shape_cast %9 : vector<1x48xf32> to vector<1x1x48xf32>
    %11 = vector.broadcast %10 : vector<1x1x48xf32> to vector<16x16x48xf32>
    %12 = arith.addf %8, %11 : vector<16x16x48xf32>
    %c0_6 = arith.constant 0 : index
    %c0_7 = arith.constant 0 : index
    %c0_8 = arith.constant 0 : index
    %13 = vector.load %arg2[%c0_6, %c0_7, %c0_8] : memref<16x16x1xi32, #tpu.memory_space<vmem>>, vector<16x16x1xi32>
    %c1_i32 = arith.constant 1 : i32
    %14 = vector.broadcast %c1_i32 : i32 to vector<16x16x1xi32>
    %15 = arith.cmpi eq, %13, %14 : vector<16x16x1xi32>
    %cst_9 = arith.constant 0.000000e+00 : f32
    %cst_10 = arith.constant -1.000000e+02 : f32
    %16 = vector.broadcast %cst_9 : f32 to vector<16x16x1xf32>
    %17 = vector.broadcast %cst_10 : f32 to vector<16x16x1xf32>
    %18 = arith.select %15, %16, %17 : vector<16x16x1xi1>, vector<16x16x1xf32>
    %19 = vector.broadcast %18 : vector<16x16x1xf32> to vector<16x16x48xf32>
    %20 = arith.addf %12, %19 : vector<16x16x48xf32>
    %cst_11 = arith.constant 0.000000e+00 : f32
    %21 = vector.broadcast %cst_11 : f32 to vector<16x16x48xf32>
    %22 = arith.maximumf %20, %21 : vector<16x16x48xf32>
    %cst_12 = arith.constant dense<0xFF800000> : vector<16x48xf32>
    %23 = vector.multi_reduction <maximumf>, %22, %cst_12 [0] : vector<16x16x48xf32> to vector<16x48xf32>
    %c0_13 = arith.constant 0 : index
    %c0_14 = arith.constant 0 : index
    %c0_15 = arith.constant 0 : index
    %24 = vector.load %arg5[%c0_13, %c0_14, %c0_15] : memref<3x48x5xf32, #tpu.memory_space<vmem>>, vector<1x48x5xf32>
    %25 = vector.shape_cast %24 : vector<1x48x5xf32> to vector<48x5xf32>
    %cst_16 = arith.constant dense<0.000000e+00> : vector<16x5xf32>
    %26 = tpu.matmul %23, %25, %cst_16 {dimension_numbers = #tpu.dot_dimension_numbers<[1], [0], [0], [1], [0, 0, 1, 1], [], []>} : vector<16x48xf32>, vector<48x5xf32>, vector<16x5xf32> -> vector<16x5xf32>
    %c2_i32 = arith.constant 2 : i32
    %27 = vector.broadcast %c2_i32 : i32 to vector<16x16x1xi32>
    %28 = arith.cmpi eq, %13, %27 : vector<16x16x1xi32>
    %cst_17 = arith.constant 0.000000e+00 : f32
    %cst_18 = arith.constant -1.000000e+02 : f32
    %29 = vector.broadcast %cst_17 : f32 to vector<16x16x1xf32>
    %30 = vector.broadcast %cst_18 : f32 to vector<16x16x1xf32>
    %31 = arith.select %28, %29, %30 : vector<16x16x1xi1>, vector<16x16x1xf32>
    %32 = vector.broadcast %31 : vector<16x16x1xf32> to vector<16x16x48xf32>
    %33 = arith.addf %12, %32 : vector<16x16x48xf32>
    %cst_19 = arith.constant 0.000000e+00 : f32
    %34 = vector.broadcast %cst_19 : f32 to vector<16x16x48xf32>
    %35 = arith.maximumf %33, %34 : vector<16x16x48xf32>
    %cst_20 = arith.constant dense<0xFF800000> : vector<16x48xf32>
    %36 = vector.multi_reduction <maximumf>, %35, %cst_20 [0] : vector<16x16x48xf32> to vector<16x48xf32>
    %c1 = arith.constant 1 : index
    %c0_21 = arith.constant 0 : index
    %c0_22 = arith.constant 0 : index
    %37 = vector.load %arg5[%c1, %c0_21, %c0_22] : memref<3x48x5xf32, #tpu.memory_space<vmem>>, vector<1x48x5xf32>
    %38 = vector.shape_cast %37 : vector<1x48x5xf32> to vector<48x5xf32>
    %cst_23 = arith.constant dense<0.000000e+00> : vector<16x5xf32>
    %39 = tpu.matmul %36, %38, %cst_23 {dimension_numbers = #tpu.dot_dimension_numbers<[1], [0], [0], [1], [0, 0, 1, 1], [], []>} : vector<16x48xf32>, vector<48x5xf32>, vector<16x5xf32> -> vector<16x5xf32>
    %40 = arith.addf %26, %39 : vector<16x5xf32>
    %c3_i32 = arith.constant 3 : i32
    %41 = vector.broadcast %c3_i32 : i32 to vector<16x16x1xi32>
    %42 = arith.cmpi eq, %13, %41 : vector<16x16x1xi32>
    %cst_24 = arith.constant 0.000000e+00 : f32
    %cst_25 = arith.constant -1.000000e+02 : f32
    %43 = vector.broadcast %cst_24 : f32 to vector<16x16x1xf32>
    %44 = vector.broadcast %cst_25 : f32 to vector<16x16x1xf32>
    %45 = arith.select %42, %43, %44 : vector<16x16x1xi1>, vector<16x16x1xf32>
    %46 = vector.broadcast %45 : vector<16x16x1xf32> to vector<16x16x48xf32>
    %47 = arith.addf %12, %46 : vector<16x16x48xf32>
    %cst_26 = arith.constant 0.000000e+00 : f32
    %48 = vector.broadcast %cst_26 : f32 to vector<16x16x48xf32>
    %49 = arith.maximumf %47, %48 : vector<16x16x48xf32>
    %cst_27 = arith.constant dense<0xFF800000> : vector<16x48xf32>
    %50 = vector.multi_reduction <maximumf>, %49, %cst_27 [0] : vector<16x16x48xf32> to vector<16x48xf32>
    %c2 = arith.constant 2 : index
    %c0_28 = arith.constant 0 : index
    %c0_29 = arith.constant 0 : index
    %51 = vector.load %arg5[%c2, %c0_28, %c0_29] : memref<3x48x5xf32, #tpu.memory_space<vmem>>, vector<1x48x5xf32>
    %52 = vector.shape_cast %51 : vector<1x48x5xf32> to vector<48x5xf32>
    %cst_30 = arith.constant dense<0.000000e+00> : vector<16x5xf32>
    %53 = tpu.matmul %50, %52, %cst_30 {dimension_numbers = #tpu.dot_dimension_numbers<[1], [0], [0], [1], [0, 0, 1, 1], [], []>} : vector<16x48xf32>, vector<48x5xf32>, vector<16x5xf32> -> vector<16x5xf32>
    %54 = arith.addf %40, %53 : vector<16x5xf32>
    %c0_31 = arith.constant 0 : index
    %c0_32 = arith.constant 0 : index
    %55 = vector.load %arg6[%c0_31, %c0_32] : memref<1x5xf32, #tpu.memory_space<vmem>>, vector<1x5xf32>
    %56 = vector.broadcast %55 : vector<1x5xf32> to vector<16x5xf32>
    %57 = arith.addf %54, %56 : vector<16x5xf32>
    %c0_33 = arith.constant 0 : index
    %c0_34 = arith.constant 0 : index
    %58 = vector.load %arg7[%c0_33, %c0_34] : memref<16x5xf32, #tpu.memory_space<vmem>>, vector<16x5xf32>
    tpu.vector_store %arg7[%c0_33, %c0_34], %57 {strides = array<i32>} : memref<16x5xf32, #tpu.memory_space<vmem>>, vector<16x5xf32>,
    return
  }
  func.func @transform_0(%arg0: i32) -> (i32, i32, i32) {
    %c0_i32 = arith.constant 0 : i32
    %c0_i32_0 = arith.constant 0 : i32
    %c0_i32_1 = arith.constant 0 : i32
    return %c0_i32, %arg0, %c0_i32_0 : i32, i32, i32
  }
  func.func @transform_1(%arg0: i32) -> (i32, i32, i32) {
    %c0_i32 = arith.constant 0 : i32
    %c0_i32_0 = arith.constant 0 : i32
    %c0_i32_1 = arith.constant 0 : i32
    return %c0_i32, %arg0, %c0_i32_0 : i32, i32, i32
  }
  func.func @transform_2(%arg0: i32) -> (i32, i32) {
    %c0_i32 = arith.constant 0 : i32
    %c0_i32_0 = arith.constant 0 : i32
    %c0_i32_1 = arith.constant 0 : i32
    return %c0_i32, %c0_i32_0 : i32, i32
  }
  func.func @transform_3(%arg0: i32) -> (i32, i32) {
    %c0_i32 = arith.constant 0 : i32
    %c0_i32_0 = arith.constant 0 : i32
    %c0_i32_1 = arith.constant 0 : i32
    return %c0_i32, %c0_i32_0 : i32, i32
  }
  func.func @transform_4(%arg0: i32) -> (i32, i32, i32) {
    %c0_i32 = arith.constant 0 : i32
    %c0_i32_0 = arith.constant 0 : i32
    %c0_i32_1 = arith.constant 0 : i32
    %c0_i32_2 = arith.constant 0 : i32
    return %c0_i32, %c0_i32_0, %c0_i32_1 : i32, i32, i32
  }
  func.func @transform_5(%arg0: i32) -> (i32, i32) {
    %c0_i32 = arith.constant 0 : i32
    %c0_i32_0 = arith.constant 0 : i32
    %c0_i32_1 = arith.constant 0 : i32
    return %c0_i32, %c0_i32_0 : i32, i32
  }
  func.func @transform_6(%arg0: i32) -> (i32, i32) {
    %c0_i32 = arith.constant 0 : i32
    %c0_i32_0 = arith.constant 0 : i32
    return %arg0, %c0_i32 : i32, i32
  }
}

</mosaic_0001>

<bundles_post_ra>
// kernel: pcnn_forward.1
= control target key start
LH: loop header
LB: loop body
LE: loop exit
PB: predicated region body
PF: predicated region fallthrough
CT: control target
= control target key end

     0   :  { %v2514_v1 = vmov 0   ;;  %s2515_s25 = smov 64   ;;  %s2516_s28 = smov 32   ;;  %v2517_v34 = vmov -100.0   ;;  %s3923_s0 = inlined_call_operand.vmem [shape: bf16[18,16,32], index: 0, kind: input, shape index: {}]   ;;  %s3924_s2 = inlined_call_operand.vmem [shape: bf16[96,48], index: 2, kind: input, shape index: {}]   ;;  %s3925_s1 = inlined_call_operand.vmem [shape: s32[16,16,1], index: 1, kind: input, shape index: {}]   ;;  %s3926_s4 = inlined_call_operand.vmem [shape: f32[3,48,5], index: 4, kind: input, shape index: {}]   ;;  %s3927_s3 = inlined_call_operand.vmem [shape: f32[1,48], index: 3, kind: input, shape index: {}]   ;;  %s3928_s5 = inlined_call_operand.vmem [shape: f32[1,5], index: 5, kind: input, shape index: {}]   ;;  %s3929_s6 = inlined_call_operand.vmem [shape: f32[16,5], index: 6, kind: output, shape index: {}]  }
   0x1   :  { %v2556_v0 = vld [vmem:[%s3923_s0 + $0x10] sm:$0xff]   ;;  %2158 = vset.pattern.permute.xlu1 %v2514_v1  ;;  %2152 = vset.pattern.permute.xlu0 %v2514_v1  ;;  %v2561_v2 = vld [vmem:[%s3923_s0 + $0x8] sm:$0xff]   ;;  %v2568_v3 = vld [vmem:[%s3923_s0 + $0x18] sm:$0xff]  }
   0x2   :  { %182 = vrot.lane.b32.xlu1 %v2556_v0, %s2515_s25  ;;  %145 = vrot.lane.b32.xlu0 %v2561_v2, %s2516_s28  ;;  %v2577_v4 = vld [vmem:[%s3923_s0 + $0x20] sm:$0xff]   ;;  %v2586_v5 = vld [vmem:[%s3923_s0 + $0x28] sm:$0xff]  }
   0x3   :  { %v2595_v6 = vld [vmem:[%s3923_s0 + $0x30] sm:$0xff]   ;;  %v2604_v7 = vld [vmem:[%s3923_s0 + $0x38] sm:$0xff]   ;;  %v2411_v8 = vld [vmem:[%s3924_s2 + $0x28] sm:$0xff]  }
   0x4   :  { %v2616_v9 = vld [vmem:[%s3923_s0 + $0x40] sm:$0xff]   ;;  %2047 = vmatprep.subr.bf16.mxu0 %v2411_v8  ;;  %2136 = vmatprep.subr.bf16.mxu1 %v2411_v8  ;;  %v2628_v11 = vld [vmem:[%s3923_s0 + $0x48] sm:$0xff]   ;;  %v2413_v12 = vld [vmem:[%s3924_s2 + $0x18] sm:$0xff]  }
   0x5   :  { %2048 = vmatpush3.bf16.msra.mxu0 %v2411_v8  ;;  %v2412_v10 = vld [vmem:[%s3924_s2 + $0x20] sm:$0xff]   ;;  %2142 = vmatpush3.bf16.msra.mxu1 %v2411_v8  ;;  %v2640_v13 = vld [vmem:[%s3923_s0 + $0x50] sm:$0xff]   ;;  %v2415_v15 = vld [vmem:[%s3924_s2 + $0x8] sm:$0xff]  }
   0x6   :  { %184 = vrot.lane.b32.xlu1 %v2568_v3, %s2515_s25  ;;  %147 = vrot.lane.b32.xlu0 %v2556_v0, %s2516_s28  ;;  %3955 = vst [vmem:[#allocation2_spill] sm:$0xff] %v2640_v13  ;;  %v2414_v14 = vld [vmem:[%s3924_s2 + $0x10] sm:$0xff]   ;;  %v2655_v16 = vld [vmem:[%s3923_s0 + $0x58] sm:$0xff]  }
   0x7   :  { %2049 = vmatprep.subr.bf16.mxu0 %v2412_v10  ;;  %2137 = vmatprep.subr.bf16.mxu1 %v2412_v10  ;;  %v2417_v17 = vld [vmem:[%s3924_s2] sm:$0xff]   ;;  %v2667_v18 = vld [vmem:[%s3923_s0 + $0x70] sm:$0xff]   ;;  %v2674_v19 = vld [vmem:[%s3923_s0 + $0x68] sm:$0xff]  }
   0x8   :  { %3956 = vst [vmem:[#allocation3_spill] sm:$0xff] %v2667_v18  ;;  %v2681_v20 = vld [vmem:[%s3923_s0 + $0x78] sm:$0xff]   ;;  %v2690_v21 = vld [vmem:[%s3923_s0 + $0x60] sm:$0xff]   ;;  %v2697_v22 = vld [vmem:[%s3925_s1 + $0x10] sm:$0xff] }
   0x9   :  { %2050 = vmatpush3.bf16.msra.mxu0 %v2412_v10  ;;  %2143 = vmatpush3.bf16.msra.mxu1 %v2412_v10  ;;  %3957 = vst [vmem:[#allocation4_spill] sm:$0xff] %v2681_v20  ;;  %v2702_v23 = vld [vmem:[%s3925_s1 + $0x18] sm:$0xff]  ;;  %v2707_v24 = vld [vmem:[%s3925_s1] sm:$0xff]  ;;  %v2712_v25 = vld [vmem:[%s3925_s1 + $0x8] sm:$0xff]  ;;  %vm611_vm0 = vcmp.eq.s32.totalorder %v2697_v22, 1 }
   0xa   :  { %151 = vrot.lane.b32.xlu1 %v2577_v4, %s2516_s28  ;;  %149 = vrot.lane.b32.xlu0 %v2568_v3, %s2516_s28  ;;  %v2717_v26 = vld [vmem:[%s3925_s1 + $0x20] sm:$0xff]  ;;  %v2724_v27 = vld [vmem:[%s3925_s1 + $0x28] sm:$0xff]  ;;  %vm612_vm1 = vcmp.eq.s32.totalorder %v2702_v23, 1  ;;  %vm609_vm2 = vcmp.eq.s32.totalorder %v2707_v24, 1  ;;  %vm610_vm3 = vcmp.eq.s32.totalorder %v2712_v25, 1  ;;  %v643_v35 = vsel %vm611_vm0, 0.0, %v2517_v34 }
   0xb   :  { %2051 = vmatprep.subr.bf16.mxu0 %v2413_v12  ;;  %2138 = vmatprep.subr.bf16.mxu1 %v2413_v12  ;;  %v2729_v28 = vld [vmem:[%s3925_s1 + $0x30] sm:$0xff]  ;;  %v2734_v29 = vld [vmem:[%s3925_s1 + $0x38] sm:$0xff]  ;;  %v2742_v30 = vld [vmem:[%s3925_s1 + $0x40] sm:$0xff]  ;;  %vm613_vm4 = vcmp.eq.s32.totalorder %v2717_v26, 1  ;;  %vm614_vm5 = vcmp.eq.s32.totalorder %v2724_v27, 1  ;;  %v644_v36 = vsel %vm612_vm1, 0.0, %v2517_v34 }
   0xc   :  { %v2747_v31 = vld [vmem:[%s3925_s1 + $0x48] sm:$0xff]  ;;  %vm615_vm6 = vcmp.eq.s32.totalorder %v2729_v28, 1  ;;  %vm616_vm7 = vcmp.eq.s32.totalorder %v2734_v29, 1  ;;  %v2759_v32 = vld [vmem:[%s3925_s1 + $0x50] sm:$0xff]  ;;  %v2409_v33 = vld [vmem:[%s3923_s0 + $0x80] sm:$0xff]   ;;  %vm617_vm8 = vcmp.eq.s32.totalorder %v2742_v30, 1  ;;  %v2159_v47 = vpack.i.bf16 %v644_v36, %v643_v35 }
   0xd   :  { %2052 = vmatpush3.bf16.msra.mxu0 %v2413_v12  ;;  %2144 = vmatpush3.bf16.msra.mxu1 %v2413_v12  ;;  %vm618_vm9 = vcmp.eq.s32.totalorder %v2747_v31, 1  ;;  %v641_v37 = vsel %vm609_vm2, 0.0, %v2517_v34  ;;  %v642_v38 = vsel %vm610_vm3, 0.0, %v2517_v34  ;;  %v2775_v39 = vsel %vm613_vm4, 0.0, %v2517_v34  ;;  %v2780_v40 = vld [vmem:[%s3925_s1 + $0x58] sm:$0xff]  ;;  %v2410_v46 = vld [vmem:[%s3923_s0 + $0x88] sm:$0xff]  }
   0xe   :  { %188 = vrot.lane.b32.xlu1 %v2586_v5, %s2515_s25  ;;  %186 = vrot.lane.b32.xlu0 %v2577_v4, %s2515_s25  ;;  %v2785_v41 = vsel %vm614_vm5, 0.0, %v2517_v34  ;;  %v2790_v42 = vsel %vm615_vm6, 0.0, %v2517_v34  ;;  %v2795_v43 = vsel %vm616_vm7, 0.0, %v2517_v34  ;;  %vm619_vm10 = vcmp.eq.s32.totalorder %v2759_v32, 1  ;;  %v2821_v52 = vld [vmem:[%s3925_s1 + $0x60] sm:$0xff]  ;;  %v2826_v53 = vld [vmem:[%s3925_s1 + $0x68] sm:$0xff] }
   0xf   :  { %2053 = vmatprep.subr.bf16.mxu0 %v2414_v14  ;;  %2139 = vmatprep.subr.bf16.mxu1 %v2414_v14  ;;  %v2799_v44 = vsel %vm617_vm8, 0.0, %v2517_v34  ;;  %v2802_v45 = vsel %vm618_vm9, 0.0, %v2517_v34  ;;  %v2153_v48 = vpack.i.bf16 %v642_v38, %v641_v37  ;;  %vm620_vm11 = vcmp.eq.s32.totalorder %v2780_v40, 1  ;;  %v2834_v55 = vld [vmem:[%s3925_s1 + $0x70] sm:$0xff]  ;;  %v2847_v58 = vld [vmem:[%s3925_s1 + $0x78] sm:$0xff]  ;;  %v2915_v38 = vld [vmem:[%s3925_s1 + $0x88] sm:$0xff] }
  0x10   :  { %v2164_v49 = vpack.i.bf16 %v2785_v41, %v2775_v39  ;;  %v2169_v50 = vpack.i.bf16 %v2795_v43, %v2790_v42  ;;  %v2816_v51 = vsel %vm619_vm10, 0.0, %v2517_v34  ;;  %vm1486_vm12 = vcmp.eq.s32.totalorder %v2712_v25, 3  ;;  %v2927_v42 = vld [vmem:[%s3925_s1 + $0x98] sm:$0xff] }
  0x11   :  { %2054 = vmatpush3.bf16.msra.mxu0 %v2414_v14  ;;  %2145 = vmatpush3.bf16.msra.mxu1 %v2414_v14  ;;  %v2174_v54 = vpack.i.bf16 %v2802_v45, %v2799_v44  ;;  %vm1488_vm13 = vcmp.eq.s32.totalorder %v2702_v23, 3  ;;  %v2838_v56 = vsel %vm1486_vm12, 0.0, %v2517_v34  ;;  %vm1490_vm14 = vcmp.eq.s32.totalorder %v2724_v27, 3 }
  0x12   :  { %155 = vrot.lane.b32.xlu1 %v2595_v6, %s2516_s28  ;;  %153 = vrot.lane.b32.xlu0 %v2586_v5, %s2516_s28  ;;  %v2842_v57 = vsel %vm620_vm11, 0.0, %v2517_v34  ;;  %v2850_v59 = vsel %vm1488_vm13, 0.0, %v2517_v34  ;;  %vm1492_vm15 = vcmp.eq.s32.totalorder %v2734_v29, 3  ;;  %v2854_v60 = vsel %vm1490_vm14, 0.0, %v2517_v34 }
  0x13   :  { %2055 = vmatprep.subr.bf16.mxu0 %v2415_v15  ;;  %2140 = vmatprep.subr.bf16.mxu1 %v2415_v15  ;;  %vm621_vm0 = vcmp.eq.s32.totalorder %v2821_v52, 1  ;;  %vm622_vm1 = vcmp.eq.s32.totalorder %v2826_v53, 1  ;;  %v2862_v62 = vsel %vm1492_vm15, 0.0, %v2517_v34  ;;  %vm623_vm2 = vcmp.eq.s32.totalorder %v2834_v55, 1 }
  0x14   :  { %vm1493_vm3 = vcmp.eq.s32.totalorder %v2742_v30, 3  ;;  %vm1495_vm4 = vcmp.eq.s32.totalorder %v2759_v32, 3  ;;  %vm624_vm5 = vcmp.eq.s32.totalorder %v2847_v58, 1  ;;  %vm1494_vm6 = vcmp.eq.s32.totalorder %v2747_v31, 3 }
  0x15   :  { %2056 = vmatpush3.bf16.msra.mxu0 %v2415_v15  ;;  %2146 = vmatpush3.bf16.msra.mxu1 %v2415_v15  ;;  %v2872_v1 = vsel %vm1493_vm3, 0.0, %v2517_v34  ;;  %v2875_v8 = vsel %vm1495_vm4, 0.0, %v2517_v34  ;;  %vm1496_vm7 = vcmp.eq.s32.totalorder %v2780_v40, 3  ;;  %v2882_v12 = vsel %vm1494_vm6, 0.0, %v2517_v34 }
  0x16   :  { %192 = vrot.lane.b32.xlu1 %v2604_v7, %s2515_s25  ;;  %190 = vrot.lane.b32.xlu0 %v2595_v6, %s2515_s25  ;;  %vm1497_vm8 = vcmp.eq.s32.totalorder %v2821_v52, 3  ;;  %v2886_v14 = vsel %vm1496_vm7, 0.0, %v2517_v34  ;;  %vm1499_vm9 = vcmp.eq.s32.totalorder %v2834_v55, 3  ;;  %vm1498_vm10 = vcmp.eq.s32.totalorder %v2826_v53, 3 }
  0x17   :  { %2057 = vmatprep.subr.bf16.mxu0 %v2417_v17  ;;  %2141 = vmatprep.subr.bf16.mxu1 %v2417_v17  ;;  %v2890_v15 = vsel %vm1497_vm8, 0.0, %v2517_v34  ;;  %v2906_v36 = vsel %vm1499_vm9, 0.0, %v2517_v34  ;;  %vm1500_vm11 = vcmp.eq.s32.totalorder %v2847_v58, 3  ;;  %v2910_v37 = vsel %vm1498_vm10, 0.0, %v2517_v34 }
  0x18   :  { %v2920_v41 = vsel %vm1500_vm11, 0.0, %v2517_v34  ;;  %vm1502_vm14 = vcmp.eq.s32.totalorder %v2915_v38, 3  ;;  %vm1504_vm15 = vcmp.eq.s32.totalorder %v2927_v42, 3  ;;  %v653_v43 = vsel %vm621_vm0, 0.0, %v2517_v34 }
  0x19   :  { %2058 = vmatpush3.bf16.msra.mxu0 %v2417_v17  ;;  %2147 = vmatpush3.bf16.msra.mxu1 %v2417_v17  ;;  %v2896_v17 = vld [vmem:[%s3925_s1 + $0x80] sm:$0xff]  ;;  %v2944_v35 = vsel %vm1502_vm14, 0.0, %v2517_v34  ;;  %v656_v39 = vsel %vm624_vm5, 0.0, %v2517_v34  ;;  %vm626_vm4 = vcmp.eq.s32.totalorder %v2915_v38, 1  ;;  %vm968_vm5 = vcmp.eq.s32.totalorder %v2697_v22, 2 }
  0x1a   :  { %159 = vrot.lane.b32.xlu1 %v2616_v9, %s2516_s28  ;;  %157 = vrot.lane.b32.xlu0 %v2604_v7, %s2516_s28  ;;  %vm1501_vm12 = vcmp.eq.s32.totalorder %v2896_v17, 3  ;;  %vm625_vm3 = vcmp.eq.s32.totalorder %v2896_v17, 1  ;;  %vm970_vm6 = vcmp.eq.s32.totalorder %v2717_v26, 2  ;;  %vm972_vm7 = vcmp.eq.s32.totalorder %v2729_v28, 2 }
  0x1b   :  { %v657_v61 = vsel %vm625_vm3, 0.0, %v2517_v34  ;;  %vm967_vm8 = vcmp.eq.s32.totalorder %v2712_v25, 2  ;;  %vm969_vm9 = vcmp.eq.s32.totalorder %v2702_v23, 2  ;;  %vm971_vm10 = vcmp.eq.s32.totalorder %v2724_v27, 2 }
  0x1c   :  { %vm973_vm11 = vcmp.eq.s32.totalorder %v2734_v29, 2  ;;  %vm975_vm14 = vcmp.eq.s32.totalorder %v2747_v31, 2  ;;  %vm978_vm3 = vcmp.eq.s32.totalorder %v2821_v52, 2  ;;  %v3013_v52 = vld [vmem:[%s3925_s1 + $0xa0] sm:$0xff] }
  0x1e   :  { %196 = vrot.lane.b32.xlu1 %v2628_v11, %s2515_s25  ;;  %194 = vrot.lane.b32.xlu0 %v2616_v9, %s2515_s25 }
  0x22   :  { %163 = vrot.lane.b32.xlu1 %v2640_v13, %s2516_s28  ;;  %161 = vrot.lane.b32.xlu0 %v2628_v11, %s2516_s28 }
  0x26   :  { %200 = vrot.lane.b32.xlu1 %v2655_v16, %s2515_s25  ;;  %198 = vrot.lane.b32.xlu0 %v2640_v13, %s2515_s25 }
  0x2a   :  { %171 = vrot.lane.b32.xlu1 %v2667_v18, %s2516_s28  ;;  %169 = vrot.lane.b32.xlu0 %v2674_v19, %s2516_s28 }
  0x2e   :  { %208 = vrot.lane.b32.xlu1 %v2681_v20, %s2515_s25  ;;  %206 = vrot.lane.b32.xlu0 %v2667_v18, %s2515_s25  ;;  %v658_v18 = vsel %vm626_vm4, 0.0, %v2517_v34  ;;  %vm980_vm4 = vcmp.eq.s32.totalorder %v2834_v55, 2 }
  0x2f   :  { %v2194_v44 = vpack.i.bf16 %v658_v18, %v657_v61  ;;  %v1001_v61 = vsel %vm969_vm9, 0.0, %v2517_v34 }
  0x32   :  { %167 = vrot.lane.b32.xlu1 %v2690_v21, %s2516_s28  ;;  %165 = vrot.lane.b32.xlu0 %v2655_v16, %s2516_s28 }
  0x36   :  { %204 = vrot.lane.b32.xlu1 %v2674_v19, %s2515_s25  ;;  %202 = vrot.lane.b32.xlu0 %v2690_v21, %s2515_s25 }
  0x3a   :  { %175 = vrot.lane.b32.xlu1 %v2409_v33, %s2516_s28  ;;  %173 = vrot.lane.b32.xlu0 %v2681_v20, %s2516_s28 }
  0x3e   :  { %212 = vrot.lane.b32.xlu1 %v2410_v46, %s2515_s25  ;;  %210 = vrot.lane.b32.xlu0 %v2409_v33, %s2515_s25  ;;  %v2901_v33 = vld [vmem:[%s3925_s1 + $0x90] sm:$0xff]  ;;  %v2932_v46 = vsel %vm1501_vm12, 0.0, %v2517_v34  ;;  %vm974_vm12 = vcmp.eq.s32.totalorder %v2742_v30, 2 }
  0x3f   :  { %vm1503_vm13 = vcmp.eq.s32.totalorder %v2901_v33, 3  ;;  %vm627_vm0 = vcmp.eq.s32.totalorder %v2901_v33, 1  ;;  %v1006_v27 = vsel %vm974_vm12, 0.0, %v2517_v34 }
  0x40   :  { %v659_v20 = vsel %vm627_vm0, 0.0, %v2517_v34  ;;  %vm979_vm0 = vcmp.eq.s32.totalorder %v2826_v53, 2  ;;  %v3018_v53 = vld [vmem:[%s3925_s1 + $0xb0] sm:$0xff] }
  0x41   :  { %vm988_vm9 = vcmp.eq.s32.totalorder %v3018_v53, 2 }
  0x42   :  { %2160 = vperm.xlu1 %2158, %v2159_v47   ;;  %2154 = vperm.xlu0 %2152, %v2153_v48   ;;  %v2935_v47 = vsel %vm1503_vm13, 0.0, %v2517_v34  ;;  %v2179_v48 = vpack.i.bf16 %v2842_v57, %v2816_v51  ;;  %v655_v51 = vsel %vm623_vm2, 0.0, %v2517_v34  ;;  %v2956_v57 = vsel %vm1504_vm15, 0.0, %v2517_v34 }
  0x43   :  { %v2189_v63 = vpack.i.bf16 %v656_v39, %v655_v51  ;;  %vm966_vm2 = vcmp.eq.s32.totalorder %v2707_v24, 2  ;;  %v1000_v39 = vsel %vm968_vm5, 0.0, %v2517_v34  ;;  %vm976_vm13 = vcmp.eq.s32.totalorder %v2759_v32, 2 }
  0x44   :  { %vm977_vm15 = vcmp.eq.s32.totalorder %v2780_v40, 2  ;;  %v1008_v29 = vsel %vm976_vm13, 0.0, %v2517_v34  ;;  %v1010_v32 = vsel %vm978_vm3, 0.0, %v2517_v34  ;;  %v1012_v40 = vsel %vm980_vm4, 0.0, %v2517_v34 }
  0x45   :  { %v1009_v51 = vsel %vm977_vm15, 0.0, %v2517_v34  ;;  %v2224_v30 = vpack.i.bf16 %v1008_v29, %v1006_v27  ;;  %vm984_vm5 = vcmp.eq.s32.totalorder %v2901_v33, 2  ;;  %v2234_v55 = vpack.i.bf16 %v1012_v40, %v1010_v32  ;;  %v3069_v27 = vld [vmem:[%s3925_s1 + $0xe0] sm:$0xff]  ;;  %v3074_v29 = vld [vmem:[%s3925_s1 + $0xf0] sm:$0xff] }
  0x46   :  { %2165 = vperm.xlu1 %2158, %v2164_v49   ;;  %2170 = vperm.xlu0 %2152, %v2169_v50   ;;  %v654_v49 = vsel %vm622_vm1, 0.0, %v2517_v34  ;;  %v2359_v50 = vpack.i.bf16 %v2956_v57, %v2944_v35  ;;  %vm628_vm1 = vcmp.eq.s32.totalorder %v2927_v42, 1  ;;  %vm994_vm3 = vcmp.eq.s32.totalorder %v3069_v27, 2 }
  0x47   :  { %v2184_v10 = vpack.i.bf16 %v654_v49, %v653_v43  ;;  %v660_v13 = vsel %vm628_vm1, 0.0, %v2517_v34  ;;  %v1002_v43 = vsel %vm970_vm6, 0.0, %v2517_v34  ;;  %v1007_v49 = vsel %vm975_vm14, 0.0, %v2517_v34 }
  0x48   :  { %v2199_v45 = vpack.i.bf16 %v660_v13, %v659_v20  ;;  %v999_v20 = vsel %vm967_vm8, 0.0, %v2517_v34  ;;  %vm981_vm1 = vcmp.eq.s32.totalorder %v2847_v58, 2  ;;  %v2229_v31 = vpack.i.bf16 %v1009_v51, %v1007_v49  ;;  %v3023_v58 = vld [vmem:[%s3925_s1 + $0xa8] sm:$0xff] }
  0x49   :  { %v2214_v23 = vpack.i.bf16 %v1001_v61, %v999_v20  ;;  %vm983_vm6 = vcmp.eq.s32.totalorder %v2915_v38, 2  ;;  %vm986_vm8 = vcmp.eq.s32.totalorder %v3013_v52, 2  ;;  %v3056_v20 = vld [vmem:[%s3925_s1 + $0xd8] sm:$0xff]  ;;  %v3079_v51 = vld [vmem:[%s3925_s1 + $0xe8] sm:$0xff]  ;;  %vm996_vm4 = vcmp.eq.s32.totalorder %v3074_v29, 2 }
  0x4a   :  { %2175 = vperm.xlu1 %2158, %v2174_v54   ;;  %2180 = vperm.xlu0 %2152, %v2179_v48   ;;  %v998_v54 = vsel %vm966_vm2, 0.0, %v2517_v34  ;;  %v1004_v48 = vsel %vm972_vm7, 0.0, %v2517_v34  ;;  %vm982_vm2 = vcmp.eq.s32.totalorder %v2896_v17, 2  ;;  %vm985_vm7 = vcmp.eq.s32.totalorder %v2927_v42, 2  ;;  %v3028_v17 = vld [vmem:[%s3925_s1 + $0xb8] sm:$0xff] }
  0x4b   :  { %v2204_v18 = vpack.i.bf16 %v1000_v39, %v998_v54  ;;  %v2209_v13 = vpack.i.bf16 %v1004_v48, %v1002_v43  ;;  %v1014_v38 = vsel %vm982_vm2, 0.0, %v2517_v34  ;;  %v1016_v42 = vsel %vm984_vm5, 0.0, %v2517_v34  ;;  %v3041_v43 = vld [vmem:[%s3925_s1 + $0xc0] sm:$0xff]  ;;  %v3046_v48 = vld [vmem:[%s3925_s1 + $0xd0] sm:$0xff] }
  0x4c   :  { %v1015_v54 = vsel %vm983_vm6, 0.0, %v2517_v34  ;;  %v1017_v39 = vsel %vm985_vm7, 0.0, %v2517_v34  ;;  %vm990_vm12 = vcmp.eq.s32.totalorder %v3041_v43, 2  ;;  %vm992_vm13 = vcmp.eq.s32.totalorder %v3046_v48, 2 }
  0x4d   :  { %v2249_v61 = vpack.i.bf16 %v1017_v39, %v1015_v54  ;;  %vm993_vm15 = vcmp.eq.s32.totalorder %v3056_v20, 2  ;;  %v1022_v32 = vsel %vm990_vm12, 0.0, %v2517_v34  ;;  %v1024_v40 = vsel %vm992_vm13, 0.0, %v2517_v34 }
  0x4e   :  { %2185 = vperm.xlu1 %2158, %v2184_v10   ;;  %2190 = vperm.xlu0 %2152, %v2189_v63   ;;  %v1003_v63 = vsel %vm971_vm10, 0.0, %v2517_v34  ;;  %v1005_v10 = vsel %vm973_vm11, 0.0, %v2517_v34  ;;  %vm987_vm10 = vcmp.eq.s32.totalorder %v3023_v58, 2  ;;  %vm989_vm11 = vcmp.eq.s32.totalorder %v3028_v17, 2 }
  0x4f   :  { %v2219_v25 = vpack.i.bf16 %v1005_v10, %v1003_v63  ;;  %v1018_v63 = vsel %vm986_vm8, 0.0, %v2517_v34  ;;  %v1020_v10 = vsel %vm988_vm9, 0.0, %v2517_v34  ;;  %vm629_vm2 = vcmp.eq.s32.totalorder %v3013_v52, 1 }
  0x50   :  { %v2254_v49 = vpack.i.bf16 %v1020_v10, %v1018_v63  ;;  %vm631_vm5 = vcmp.eq.s32.totalorder %v3018_v53, 1  ;;  %vm630_vm6 = vcmp.eq.s32.totalorder %v3023_v58, 1  ;;  %vm632_vm7 = vcmp.eq.s32.totalorder %v3028_v17, 1 }
  0x51   :  { %v661_v63 = vsel %vm629_vm2, 0.0, %v2517_v34  ;;  %v663_v10 = vsel %vm631_vm5, 0.0, %v2517_v34  ;;  %vm633_vm8 = vcmp.eq.s32.totalorder %v3041_v43, 1  ;;  %vm635_vm9 = vcmp.eq.s32.totalorder %v3046_v48, 1 }
  0x52   :  { %2195 = vperm.xlu1 %2158, %v2194_v44   ;;  %2200 = vperm.xlu0 %2152, %v2199_v45   ;;  %v1011_v44 = vsel %vm979_vm0, 0.0, %v2517_v34  ;;  %v1013_v45 = vsel %vm981_vm1, 0.0, %v2517_v34  ;;  %vm995_vm0 = vcmp.eq.s32.totalorder %v3079_v51, 2  ;;  %vm214_vm12 = vcmask 261120  }
  0x53   :  { %v2239_v33 = vpack.i.bf16 %v1013_v45, %v1011_v44  ;;  %v1025_v45 = vsel %vm993_vm15, 0.0, %v2517_v34  ;;  %v1027_v54 = vsel %vm995_vm0, 0.0, %v2517_v34  ;;  %vm263_vm13 = vcmask 523264  }
  0x54   :  { %vm1487_vm15 = vcmp.eq.s32.totalorder %v2697_v22, 3  ;;  %vm1491_vm0 = vcmp.eq.s32.totalorder %v2729_v28, 3  ;;  %vm639_vm2 = vcmp.eq.s32.totalorder %v3074_v29, 1  ;;  %vm638_vm5 = vcmp.eq.s32.totalorder %v3079_v51, 1 }
  0x56   :  { %2205 = vperm.xlu1 %2158, %v2204_v18   ;;  %2210 = vperm.xlu0 %2152, %v2209_v13   ;;  %v2244_v18 = vpack.i.bf16 %v1016_v42, %v1014_v38  ;;  %v3051_v13 = vld [vmem:[%s3925_s1 + $0xc8] sm:$0xff]  ;;  %v1026_v38 = vsel %vm994_vm3, 0.0, %v2517_v34  ;;  %v1028_v42 = vsel %vm996_vm4, 0.0, %v2517_v34  ;;  %vm344_vm3 = vcmask 785408  }
  0x57   :  { %vm991_vm14 = vcmp.eq.s32.totalorder %v3051_v13, 2  ;;  %vm1489_vm4 = vcmp.eq.s32.totalorder %v2717_v26, 3  ;;  %v1523_v26 = vsel %vm1491_vm0, 0.0, %v2517_v34  ;;  %vm1513_vm0 = vcmp.eq.s32.totalorder %v3069_v27, 3 }
  0x58   :  { %v1023_v44 = vsel %vm991_vm14, 0.0, %v2517_v34  ;;  %vm1485_vm14 = vcmp.eq.s32.totalorder %v2707_v24, 3  ;;  %v1519_v24 = vsel %vm1487_vm15, 0.0, %v2517_v34  ;;  %vm1510_vm15 = vcmp.eq.s32.totalorder %v3051_v13, 3 }
  0x5a   :  { %2215 = vperm.xlu1 %2158, %v2214_v23   ;;  %2220 = vperm.xlu0 %2152, %v2219_v25   ;;  %v1019_v23 = vsel %vm987_vm10, 0.0, %v2517_v34  ;;  %v1021_v25 = vsel %vm989_vm11, 0.0, %v2517_v34  ;;  %vm634_vm10 = vcmp.eq.s32.totalorder %v3051_v13, 1  ;;  %vm636_vm11 = vcmp.eq.s32.totalorder %v3056_v20, 1 }
  0x5e   :  { %2225 = vperm.xlu1 %2158, %v2224_v30   ;;  %2230 = vperm.xlu0 %2152, %v2229_v31   ;;  %v3084_v30 = vld [vmem:[%s3925_s1 + $0xf8] sm:$0xff]  ;;  %v2259_v31 = vpack.i.bf16 %v1021_v25, %v1019_v23  ;;  %v662_v23 = vsel %vm630_vm6, 0.0, %v2517_v34  ;;  %v664_v25 = vsel %vm632_vm7, 0.0, %v2517_v34  ;;  %vm1505_vm7 = vcmp.eq.s32.totalorder %v3013_v52, 3 }
  0x5f   :  { %vm997_vm1 = vcmp.eq.s32.totalorder %v3084_v30, 2  ;;  %vm640_vm6 = vcmp.eq.s32.totalorder %v3084_v30, 1 }
  0x60   :  { %v1029_v39 = vsel %vm997_vm1, 0.0, %v2517_v34  ;;  %vm637_vm1 = vcmp.eq.s32.totalorder %v3069_v27, 1 }
  0x62   :  { %2235 = vperm.xlu1 %2158, %v2234_v55   ;;  %2240 = vperm.xlu0 %2152, %v2239_v33   ;;  %v2264_v55 = vpack.i.bf16 %v1024_v40, %v1022_v32  ;;  %v2269_v33 = vpack.i.bf16 %v1025_v45, %v1023_v44  ;;  %v2289_v32 = vpack.i.bf16 %v664_v25, %v662_v23  ;;  %v665_v40 = vsel %vm633_vm8, 0.0, %v2517_v34 }
  0x63   :  { %v667_v44 = vsel %vm635_vm9, 0.0, %v2517_v34  ;;  %vm1507_vm8 = vcmp.eq.s32.totalorder %v3018_v53, 3  ;;  %vm1506_vm9 = vcmp.eq.s32.totalorder %v3023_v58, 3 }
  0x66   :  { %2245 = vperm.xlu1 %2158, %v2244_v18   ;;  %2250 = vperm.xlu0 %2152, %v2249_v61   ;;  %v2274_v18 = vpack.i.bf16 %v1028_v42, %v1026_v38  ;;  %v2279_v61 = vpack.i.bf16 %v1029_v39, %v1027_v54  ;;  %v2294_v54 = vpack.i.bf16 %v667_v44, %v665_v40 }
  0x6a   :  { %2255 = vperm.xlu1 %2158, %v2254_v49   ;;  %2260 = vperm.xlu0 %2152, %v2259_v31   ;;  %v2416_v49 = vld [vmem:[%s3923_s0] sm:$0xff]   ;;  %v2284_v31 = vpack.i.bf16 %v663_v10, %v661_v63  ;;  %v1521_v63 = vsel %vm1489_vm4, 0.0, %v2517_v34  ;;  %vm1512_vm4 = vcmp.eq.s32.totalorder %v3056_v20, 3  ;;  %v1542_v20 = vsel %vm1510_vm15, 0.0, %v2517_v34 }
  0x6e   :  { %2265 = vperm.xlu1 %2158, %v2264_v55   ;;  %2270 = vperm.xlu0 %2152, %v2269_v33   ;;  %v666_v55 = vsel %vm634_vm10, 0.0, %v2517_v34  ;;  %v668_v33 = vsel %vm636_vm11, 0.0, %v2517_v34  ;;  %vm1508_vm10 = vcmp.eq.s32.totalorder %v3028_v17, 3  ;;  %vm1509_vm11 = vcmp.eq.s32.totalorder %v3041_v43, 3 }
  0x6f   :  { %v1540_v58 = vsel %vm1508_vm10, 0.0, %v2517_v34  ;;  %v1541_v43 = vsel %vm1509_vm11, 0.0, %v2517_v34 }
  0x72   :  { %2275 = vperm.xlu1 %2158, %v2274_v18   ;;  %2280 = vperm.xlu0 %2152, %v2279_v61   ;;  %v2299_v18 = vpack.i.bf16 %v668_v33, %v666_v55  ;;  %v1517_v61 = vsel %vm1485_vm14, 0.0, %v2517_v34  ;;  %v670_v33 = vsel %vm638_vm5, 0.0, %v2517_v34  ;;  %vm1511_vm14 = vcmp.eq.s32.totalorder %v3046_v48, 3 }
  0x73   :  { %v2304_v23 = vpack.i.bf16 %v1519_v24, %v1517_v61  ;;  %v3958_v61 = vpack.i.bf16 %v2850_v59, %v2838_v56  ;;  %v1543_v48 = vsel %vm1511_vm14, 0.0, %v2517_v34  ;;  %vm1516_vm5 = vcmp.eq.s32.totalorder %v3084_v30, 3 }
  0x74   :  { %v183_v45 = vpop.permute.xlu1 %182  ;;  %v146_v38 = vpop.permute.xlu0 %145  ;;  %v2374_v35 = vpack.i.bf16 %v1543_v48, %v1541_v43 }
  0x75   :  { %v217_v42 = vsel %vm214_vm12, %v2416_v49, %v146_v38  ;;  %v2309_v49 = vpack.i.bf16 %v1523_v26, %v1521_v63  ;;  %v672_v38 = vsel %vm640_vm6, 0.0, %v2517_v34 }
  0x76   :  { %2285 = vperm.xlu1 %2158, %v2284_v31   ;;  %v265_v39 = vsel %vm263_vm13, %v217_v42, %v183_v45  ;;  %2290 = vperm.xlu0 %2152, %v2289_v32   ;;  %v669_v31 = vsel %vm637_vm1, 0.0, %v2517_v34  ;;  %v671_v32 = vsel %vm639_vm2, 0.0, %v2517_v34  ;;  %vm1515_vm1 = vcmp.eq.s32.totalorder %v3074_v29, 3 }
  0x77   :  { %2059 = vmatprep.mubr.msk.bf16.mxu0 %vm344_vm3, %v265_v39  ;;  %vm1514_vm2 = vcmp.eq.s32.totalorder %v3079_v51, 3  ;;  %v1548_v29 = vsel %vm1516_vm5, 0.0, %v2517_v34 }
  0x78   :  { %v185_v22 = vpop.permute.xlu1 %184  ;;  %v148_v28 = vpop.permute.xlu0 %147  ;;  %v1546_v27 = vsel %vm1514_vm2, 0.0, %v2517_v34 }
  0x79   :  { %v220_v10 = vsel %vm214_vm12, %v2561_v2, %v148_v28  ;;  %v2314_v2 = vpack.i.bf16 %v671_v32, %v669_v31 }
  0x7a   :  { %2295 = vperm.xlu1 %2158, %v2294_v54   ;;  %v267_v25 = vsel %vm263_vm13, %v220_v10, %v185_v22  ;;  %2300 = vperm.xlu0 %2152, %v2299_v18  }
  0x7b   :  { %2060 = vmatmul.mubr.msk.bf16.vlgmr.msra.gmra.mxu0 %vm344_vm3, %v267_v25  ;;  %v1547_v25 = vsel %vm1515_vm1, 0.0, %v2517_v34 }
  0x7c   :  { %v152_v40 = vpop.permute.xlu1 %151  ;;  %v150_v44 = vpop.permute.xlu0 %149 }
  0x7d   :  { %v226_v45 = vsel %vm214_vm12, %v2568_v3, %v152_v40  ;;  %v223_v42 = vsel %vm214_vm12, %v2556_v0, %v150_v44  ;;  %v2329_v3 = vpack.i.bf16 %v672_v38, %v670_v33  ;;  %v3959_v0 = vpack.i.bf16 %v2862_v62, %v2854_v60 }
  0x7e   :  { %2305 = vperm.xlu1 %2158, %v2304_v23   ;;  %2310 = vperm.xlu0 %2152, %v2309_v49   ;;  %v3960_v23 = vpack.i.bf16 %v2875_v8, %v2872_v1  ;;  %v3961_v60 = vpack.i.bf16 %v2886_v14, %v2882_v12  ;;  %v3962_v62 = vpack.i.bf16 %v2906_v36, %v2890_v15  ;;  %v1537_v8 = vsel %vm1505_vm7, 0.0, %v2517_v34 }
  0x7f   :  { %v3963_v1 = vpack.i.bf16 %v2920_v41, %v2910_v37  ;;  %v1539_v12 = vsel %vm1507_vm8, 0.0, %v2517_v34  ;;  %v1538_v14 = vsel %vm1506_vm9, 0.0, %v2517_v34 }
  0x80   :  { %v189_v55 = vpop.permute.xlu1 %188  ;;  %v187_v39 = vpop.permute.xlu0 %186  ;;  %v2364_v17 = vpack.i.bf16 %v1539_v12, %v1537_v8 }
  0x81   :  { %v271_v54 = vsel %vm263_vm13, %v226_v45, %v189_v55  ;;  %v269_v18 = vsel %vm263_vm13, %v223_v42, %v187_v39 }
  0x82   :  { %2315 = vperm.xlu1 %2158, %v2314_v2   ;;  %2063 = vmatprep.mubr.msk.bf16.mxu0 %vm344_vm3, %v269_v18  ;;  %v2389_v2 = vpack.i.bf16 %v1548_v29, %v1546_v27 }
  0x83   :  { %2320 = vperm.xlu0 %2152, %v3958_v61   ;;  %2064 = vmatmul.mubr.msk.bf16.gmra.mxu0 %vm344_vm3, %v271_v54 }
  0x84   :  { %v156_v24 = vpop.permute.xlu1 %155  ;;  %v154_v22 = vpop.permute.xlu0 %153 }
  0x85   :  { %v232_v63 = vsel %vm214_vm12, %v2586_v5, %v156_v24  ;;  %v229_v28 = vsel %vm214_vm12, %v2577_v4, %v154_v22 }
  0x86   :  { %2325 = vperm.xlu1 %2158, %v3959_v0  }
  0x87   :  { %2330 = vperm.xlu0 %2152, %v2329_v3  }
  0x88   :  { %v193_v26 = vpop.permute.xlu1 %192  ;;  %v191_v59 = vpop.permute.xlu0 %190 }
  0x89   :  { %v275_v56 = vsel %vm263_vm13, %v232_v63, %v193_v26  ;;  %v273_v10 = vsel %vm263_vm13, %v229_v28, %v191_v59  ;;  %v3966_v26 = vld [vmem:[#allocation4_spill] sm:$0xff] }
  0x8a   :  { %2335 = vperm.xlu1 %2158, %v3960_v23   ;;  %2067 = vmatprep.mubr.msk.bf16.mxu0 %vm344_vm3, %v273_v10 }
  0x8b   :  { %2340 = vperm.xlu0 %2152, %v3961_v60   ;;  %2068 = vmatmul.mubr.msk.bf16.gmra.mxu0 %vm344_vm3, %v275_v56 }
  0x8c   :  { %v160_v5 = vpop.permute.xlu1 %159  ;;  %v158_v4 = vpop.permute.xlu0 %157 }
  0x8d   :  { %v238_v52 = vsel %vm214_vm12, %v2604_v7, %v160_v5  ;;  %v235_v15 = vsel %vm214_vm12, %v2595_v6, %v158_v4  ;;  %v3964_v7 = vpack.i.bf16 %v2935_v47, %v2932_v46  ;;  %v2369_v6 = vpack.i.bf16 %v1540_v58, %v1538_v14 }
  0x8e   :  { %2345 = vperm.xlu1 %2158, %v3962_v62   ;;  %v1544_v46 = vsel %vm1512_vm4, 0.0, %v2517_v34 }
  0x8f   :  { %2350 = vperm.xlu0 %2152, %v3963_v1   ;;  %v2379_v57 = vpack.i.bf16 %v1544_v46, %v1542_v20 }
  0x90   :  { %v197_v53 = vpop.permute.xlu1 %196  ;;  %v195_v37 = vpop.permute.xlu0 %194 }
  0x91   :  { %v279_v36 = vsel %vm263_vm13, %v238_v52, %v197_v53  ;;  %v277_v41 = vsel %vm263_vm13, %v235_v15, %v195_v37 }
  0x92   :  { %2355 = vperm.xlu1 %2158, %v3964_v7   ;;  %2071 = vmatprep.mubr.msk.bf16.mxu0 %vm344_vm3, %v277_v41 }
  0x93   :  { %2360 = vperm.xlu0 %2152, %v2359_v50   ;;  %2072 = vmatmul.mubr.msk.bf16.gmra.mxu0 %vm344_vm3, %v279_v36  ;;  %v1545_v50 = vsel %vm1513_vm0, 0.0, %v2517_v34 }
  0x94   :  { %v164_v13 = vpop.permute.xlu1 %163  ;;  %v162_v47 = vpop.permute.xlu0 %161  ;;  %v2384_v44 = vpack.i.bf16 %v1547_v25, %v1545_v50 }
  0x95   :  { %v244_v49 = vsel %vm214_vm12, %v2628_v11, %v164_v13  ;;  %v241_v51 = vsel %vm214_vm12, %v2616_v9, %v162_v47 }
  0x96   :  { %2365 = vperm.xlu1 %2158, %v2364_v17  }
  0x97   :  { %2370 = vperm.xlu0 %2152, %v2369_v6  }
  0x98   :  { %v201_v31 = vpop.permute.xlu1 %200  ;;  %v199_v32 = vpop.permute.xlu0 %198 }
  0x99   :  { %v283_v30 = vsel %vm263_vm13, %v244_v49, %v201_v31  ;;  %v281_v40 = vsel %vm263_vm13, %v241_v51, %v199_v32  ;;  %v1987_v31 = vld [vmem:[%s3926_s4 + $0x58] sm:$0xff]  ;;  %v1986_v51 = vld [vmem:[%s3926_s4 + $0x50] sm:$0xff] }
  0x9a   :  { %2375 = vperm.xlu1 %2158, %v2374_v35   ;;  %2075 = vmatprep.mubr.msk.bf16.mxu0 %vm344_vm3, %v281_v40 }
  0x9b   :  { %2380 = vperm.xlu0 %2152, %v2379_v57   ;;  %2076 = vmatmul.mubr.msk.bf16.gmra.mxu0 %vm344_vm3, %v283_v30  ;;  %v1985_v30 = vld [vmem:[%s3926_s4 + $0x48] sm:$0xff] }
  0x9c   :  { %v172_v11 = vpop.permute.xlu1 %171  ;;  %v170_v45 = vpop.permute.xlu0 %169  ;;  %2091 = vmatprep.subr.mxu1 %v1987_v31 }
  0x9d   :  { %v256_v9 = vsel %vm214_vm12, %v2674_v19, %v172_v11  ;;  %v253_v55 = vsel %vm214_vm12, %v2690_v21, %v170_v45  ;;  %v3965_v19 = vld [vmem:[#allocation2_spill] sm:$0xff]  ;;  %v1982_v11 = vld [vmem:[%s3926_s4 + $0x30] sm:$0xff] }
  0x9e   :  { %2385 = vperm.xlu1 %2158, %v2384_v44   ;;  %v1984_v44 = vld [vmem:[%s3926_s4 + $0x40] sm:$0xff] }
  0x9f   :  { %2390 = vperm.xlu0 %2152, %v2389_v2   ;;  %v1983_v2 = vld [vmem:[%s3926_s4 + $0x38] sm:$0xff] }
  0xa0   :  { %v209_v34 = vpop.permute.xlu1 %208  ;;  %v207_v38 = vpop.permute.xlu0 %206 }
  0xa1   :  { %v291_v33 = vsel %vm263_vm13, %v256_v9, %v209_v34  ;;  %v289_v42 = vsel %vm263_vm13, %v253_v55, %v207_v38  ;;  %v3333_v34 = vld [vmem:[%s3926_s4 + $0x28] sm:$0xff] }
  0xa2   :  { %2083 = vmatprep.mubr.msk.bf16.mxu1 %vm344_vm3, %v289_v42  ;;  %3977 = vst [vmem:[#allocation11_spill] sm:$0xff] %v3333_v34 }
  0xa3   :  { %2084 = vmatmul.mubr.msk.bf16.vlgmr.msra.gmra.mxu1 %vm344_vm3, %v291_v33 }
  0xa4   :  { %v168_v54 = vpop.permute.xlu1 %167  ;;  %v166_v39 = vpop.permute.xlu0 %165  ;;  %2092 = vmatpush3.msra.mxu1 %v1987_v31 }
  0xa5   :  { %v250_v18 = vsel %vm214_vm12, %v2655_v16, %v168_v54  ;;  %v247_v3 = vsel %vm214_vm12, %v3965_v19, %v166_v39  ;;  %v3967_v16 = vld [vmem:[#allocation3_spill] sm:$0xff]  ;;  %2093 = vmatprep.subr.mxu1 %v1986_v51 }
  0xa6   :  { %2094 = vmatpush3.msra.mxu1 %v1986_v51 }
  0xa7   :  { %2095 = vmatprep.subr.mxu1 %v1985_v30 }
  0xa8   :  { %v205_v61 = vpop.permute.xlu1 %204  ;;  %v203_v24 = vpop.permute.xlu0 %202  ;;  %2096 = vmatpush3.msra.mxu1 %v1985_v30 }
  0xa9   :  { %v287_v21 = vsel %vm263_vm13, %v250_v18, %v205_v61  ;;  %v285_v22 = vsel %vm263_vm13, %v247_v3, %v203_v24  ;;  %2097 = vmatprep.subr.mxu1 %v1984_v44 }
  0xaa   :  { %2079 = vmatprep.mubr.msk.bf16.mxu0 %vm344_vm3, %v285_v22  ;;  %2098 = vmatpush3.msra.mxu1 %v1984_v44 }
  0xab   :  { %2080 = vmatmul.mubr.msk.bf16.gmra.mxu0 %vm344_vm3, %v287_v21  ;;  %2099 = vmatprep.subr.mxu1 %v1983_v2 }
  0xac   :  { %v176_v0 = vpop.permute.xlu1 %175  ;;  %v174_v63 = vpop.permute.xlu0 %173  ;;  %2100 = vmatpush3.msra.mxu1 %v1983_v2 }
  0xad   :  { %v262_v28 = vsel %vm214_vm12, %v3966_v26, %v176_v0  ;;  %v259_v59 = vsel %vm214_vm12, %v3967_v16, %v174_v63  ;;  %2101 = vmatprep.subr.mxu1 %v1982_v11  ;;  %v3355_v0 = vld [vmem:[%s3927_s3] ss:$0 sm:$0xff]  ;;  %vm897_vm12 = vcmask 392192  }
  0xae   :  { %2102 = vmatpush3.msra.mxu1 %v1982_v11 }
  0xaf   :  { %2106 = vmatprep.subr.mxu1 %v3333_v34 }
  0xb0   :  { %v213_v56 = vpop.permute.xlu1 %212  ;;  %v211_v23 = vpop.permute.xlu0 %210 }
  0xb1   :  { %v295_v10 = vsel %vm263_vm13, %v262_v28, %v213_v56  ;;  %v293_v60 = vsel %vm263_vm13, %v259_v59, %v211_v23  ;;  %vm1934_vm13 = vcmask 39936  }
  0xb2   :  { %2087 = vmatprep.mubr.msk.bf16.mxu1 %vm344_vm3, %v293_v60 }
  0xb3   :  { %2088 = vmatmul.mubr.msk.bf16.gmra.mxu1 %vm344_vm3, %v295_v10 }
  0xbd   :  { %v3244_v5 = vpop.permute.xlu1 %2160  ;;  %v3246_v4 = vpop.permute.xlu0 %2154 }
  0xc1   :  { %v3248_v62 = vpop.permute.xlu1 %2165  ;;  %v3250_v1 = vpop.permute.xlu0 %2170 }
  0xc5   :  { %v3252_v8 = vpop.permute.xlu1 %2175  ;;  %v3254_v12 = vpop.permute.xlu0 %2180 }
  0xc9   :  { %v3256_v14 = vpop.permute.xlu1 %2185  ;;  %v3258_v52 = vpop.permute.xlu0 %2190 }
  0xcd   :  { %v3260_v53 = vpop.permute.xlu1 %2195  ;;  %v3262_v58 = vpop.permute.xlu0 %2200 }
  0xd1   :  { %v3264_v15 = vpop.permute.xlu1 %2205  ;;  %v3266_v36 = vpop.permute.xlu0 %2210 }
  0xd5   :  { %v3268_v37 = vpop.permute.xlu1 %2215  ;;  %v3270_v41 = vpop.permute.xlu0 %2220 }
  0xd9   :  { %v3272_v7 = vpop.permute.xlu1 %2225  ;;  %v3274_v17 = vpop.permute.xlu0 %2230 }
  0xdd   :  { %v3276_v6 = vpop.permute.xlu1 %2235  ;;  %v3278_v43 = vpop.permute.xlu0 %2240 }
  0xe1   :  { %v3280_v48 = vpop.permute.xlu1 %2245  ;;  %v3282_v13 = vpop.permute.xlu0 %2250 }
  0xe5   :  { %v3284_v20 = vpop.permute.xlu1 %2255  ;;  %v3286_v46 = vpop.permute.xlu0 %2260 }
  0xe6   :  { %3968 = vst [vmem:[#allocation2_spill] sm:$0xff] %v3284_v20  ;;  %3969 = vst [vmem:[#allocation4_spill] sm:$0xff] %v3286_v46 }
  0xe9   :  { %v3288_v47 = vpop.permute.xlu1 %2265  ;;  %v3290_v35 = vpop.permute.xlu0 %2270 }
  0xea   :  { %3970 = vst [vmem:[#allocation3_spill] sm:$0xff] %v3290_v35 }
  0xed   :  { %v3292_v57 = vpop.permute.xlu1 %2275  ;;  %v3294_v50 = vpop.permute.xlu0 %2280 }
  0xee   :  { %3971 = vst [vmem:[#allocation5_spill] sm:$0xff] %v3292_v57  ;;  %3972 = vst [vmem:[#allocation6_spill] sm:$0xff] %v3294_v50 }
  0xf1   :  { %v3296_v25 = vpop.permute.xlu1 %2285  ;;  %v3298_v49 = vpop.permute.xlu0 %2290 }
  0xf2   :  { %3973 = vst [vmem:[#allocation7_spill] sm:$0xff] %v3296_v25  ;;  %3974 = vst [vmem:[#allocation8_spill] sm:$0xff] %v3298_v49 }
  0xf5   :  { %v3303_v27 = vpop.permute.xlu1 %2295  ;;  %v3305_v29 = vpop.permute.xlu0 %2300 }
  0xf6   :  { %3975 = vst [vmem:[#allocation9_spill] sm:$0xff] %v3305_v29 }
  0xf9   :  { %v3313_v32 = vpop.permute.xlu1 %2305  ;;  %v3315_v40 = vpop.permute.xlu0 %2310 }
  0xfd   :  { %v3326_v45 = vpop.permute.xlu1 %2315 }
  0xfe   :  { %3976 = vst [vmem:[#allocation10_spill] sm:$0xff] %v3326_v45  ;;  %v3328_v9 = vpop.permute.xlu0 %2320 }
 0x101   :  { %v3336_v55 = vpop.permute.xlu1 %2325 }
 0x102   :  { %v3338_v33 = vpop.permute.xlu0 %2330 }
 0x103   :  { %3978 = vst [vmem:[#allocation12_spill] sm:$0xff] %v3338_v33 }
 0x105   :  { %v3340_v38 = vpop.permute.xlu1 %2335 }
 0x106   :  { %v3342_v42 = vpop.permute.xlu0 %2340 }
 0x109   :  { %v3344_v54 = vpop.permute.xlu1 %2345 }
 0x10a   :  { %v3346_v39 = vpop.permute.xlu0 %2350 }
 0x10d   :  { %v3348_v3 = vpop.permute.xlu1 %2355 }
 0x10e   :  { %v3350_v21 = vpop.permute.xlu0 %2360 }
 0x10f   :  { %3979 = vst [vmem:[#allocation13_spill] sm:$0xff] %v3350_v21 }
 0x111   :  { %v3358_v28 = vpop.permute.xlu1 %2365 }
 0x112   :  { %3980 = vst [vmem:[#allocation14_spill] sm:$0xff] %v3358_v28  ;;  %v3360_v56 = vpop.permute.xlu0 %2370 }
 0x113   :  { %3981 = vst [vmem:[#allocation15_spill] sm:$0xff] %v3360_v56 }
 0x115   :  { %v3371_v51 = vpop.permute.xlu1 %2375 }
 0x116   :  { %3982 = vst [vmem:[#allocation16_spill] sm:$0xff] %v3371_v51  ;;  %v3373_v30 = vpop.permute.xlu0 %2380 }
 0x117   :  { %3983 = vst [vmem:[#allocation17_spill] sm:$0xff] %v3373_v30 }
 0x119   :  { %v3393_v51 = vpop.permute.xlu1 %2385 }
 0x11a   :  { %3984 = vst [vmem:[#allocation18_spill] sm:$0xff] %v3393_v51  ;;  %v3395_v50 = vpop.permute.xlu0 %2390 }
 0x11b   :  { %3985 = vst [vmem:[#allocation19_spill] sm:$0xff] %v3395_v50 }
 0x13b   :  { %v2061_v18 = vpop.f32.mrf.mxu0 }
 0x13d   :  { %v411_v61 = vpop.f32.mrf.mxu0 }
 0x13e   :  { %v545_v33 = vadd.f32 %v3355_v0, %v411_v61 }
 0x13f   :  { %v2062_v19 = vpop.f32.mrf.mxu0 }
 0x140   :  { %v548_v63 = vadd.f32 %v2062_v19, %v3355_v0  ;;  %v2425_v61 = vadd.low.f32.bf16 %v545_v33, %v3246_v4  ;;  %v2426_v46 = vadd.low.f32.bf16 %v545_v33, %v3264_v15 }
 0x141   :  { %v414_v24 = vpop.f32.mrf.mxu0 }
 0x142   :  { %v2418_v59 = vadd.high.f32.bf16 %v548_v63, %v3244_v5  ;;  %v3364_v23 = vadd.f32 %v3355_v0, %v414_v24  ;;  %v547_v24 = vadd.f32 %v2061_v18, %v3355_v0 }
 0x143   :  { %v2065_v22 = vpop.f32.mrf.mxu0 }
 0x144   :  { %v868_v44 = vmax.f32 %v2418_v59, 0.0  ;;  %v2420_v19 = vadd.high.f32.bf16 %v3364_v23, %v3246_v4  ;;  %v551_v51 = vadd.f32 %v2065_v22, %v3355_v0  ;;  %v2424_v50 = vadd.high.f32.bf16 %v547_v24, %v3313_v32 }
 0x145   :  { %v427_v26 = vpop.f32.mrf.mxu0  ;;  %v2429_v22 = vadd.high.f32.bf16 %v548_v63, %v3328_v9  ;;  %v2430_v4 = vadd.low.f32.bf16 %v3364_v23, %v3268_v37 }
 0x146   :  { %v3388_v21 = vsel %vm897_vm12, %v868_v44, -inf  ;;  %v866_v18 = vmax.f32 %v2420_v19, 0.0  ;;  %v2422_v44 = vadd.low.f32.bf16 %v547_v24, %v3244_v5  ;;  %v2427_v5 = vadd.low.f32.bf16 %v545_v33, %v3313_v32 }
 0x147   :  { %v2066_v16 = vpop.f32.mrf.mxu0  ;;  %v1743_v32 = vmax.f32 %v2424_v50, 0.0  ;;  %v865_v33 = vmax.f32 %v2425_v61, 0.0  ;;  %v1223_v25 = vmax.f32 %v2430_v4, 0.0 }
 0x148   :  { %v3367_v60 = vadd.f32 %v2066_v16, %v3355_v0  ;;  %v929_v19 = vsel %vm897_vm12, %v866_v18, -inf  ;;  %v867_v45 = vmax.f32 %v2422_v44, 0.0  ;;  %v2433_v18 = vadd.high.f32.bf16 %v551_v51, %v3315_v40 }
 0x149   :  { %v430_v10 = vpop.f32.mrf.mxu0 }
 0x14a   :  { %v2419_v2 = vadd.high.f32.bf16 %v3367_v60, %v3250_v1  ;;  %v3383_v16 = vadd.f32 %v3355_v0, %v430_v10  ;;  %v3427_v44 = vsel %vm897_vm12, %v867_v45, -inf  ;;  %v1747_v29 = vmax.f32 %v2433_v18, 0.0 }
 0x14b   :  { %v3369_v31 = vpop.f32.mrf.mxu0  ;;  %v3462_v18 = vsel %vm897_vm12, %v1223_v25, -inf }
 0x14c   :  { %v872_v34 = vmax.f32 %v2419_v2, 0.0  ;;  %v2421_v2 = vadd.high.f32.bf16 %v3383_v16, %v3248_v62 }
 0x14d   :  { %v3377_v11 = vpop.f32.mrf.mxu0 }
 0x14e   :  { %v3391_v59 = vsel %vm897_vm12, %v872_v34, -inf  ;;  %v2423_v34 = vadd.high.f32.bf16 %v547_v24, %v3264_v15  ;;  %v870_v57 = vmax.f32 %v2421_v2, 0.0  ;;  %v2428_v2 = vadd.high.f32.bf16 %v548_v63, %v3268_v37 }
 0x14f   :  { %v3385_v56 = vpop.f32.mrf.mxu0  ;;  %v2431_v24 = vadd.low.f32.bf16 %v551_v51, %v3250_v1  ;;  %v1222_v63 = vmax.f32 %v2426_v46, 0.0  ;;  %v2434_v37 = vadd.low.f32.bf16 %v3364_v23, %v3328_v9  ;;  %v3439_v46 = vsel %vm897_vm12, %v1743_v32, -inf }
 0x150   :  { %v931_v10 = vsel %vm897_vm12, %v870_v57, -inf  ;;  %v1224_v35 = vmax.f32 %v2423_v34, 0.0  ;;  %v2432_v57 = vadd.high.f32.bf16 %v551_v51, %v3266_v36  ;;  %v1741_v34 = vmax.f32 %v2427_v5, 0.0 }
 0x151   :  { %v446_v30 = vpop.f32.mrf.mxu0  ;;  %v932_v49 = vmax.f32 %v929_v19, %v931_v10  ;;  %v549_v10 = vadd.f32 %v3355_v0, %v427_v26  ;;  %v1225_v51 = vmax.f32 %v2428_v2, 0.0  ;;  %v871_v50 = vmax.f32 %v2431_v24, 0.0 }
 0x152   :  { %v3423_v15 = vadd.f32 %v3355_v0, %v446_v30  ;;  %v3434_v19 = vsel %vm897_vm12, %v1224_v35, -inf  ;;  %v1744_v30 = vmax.f32 %v2429_v22, 0.0  ;;  %v1228_v61 = vmax.f32 %v2432_v57, 0.0 }
 0x153   :  { %v3403_v28 = vpop.f32.mrf.mxu0  ;;  %v3442_v26 = vsel %vm897_vm12, %v865_v33, -inf  ;;  %v2436_v9 = vadd.low.f32.bf16 %v549_v10, %v3248_v62  ;;  %v2437_v35 = vadd.low.f32.bf16 %v549_v10, %v3266_v36  ;;  %v3447_v23 = vsel %vm897_vm12, %v1222_v63, -inf }
 0x154   :  { %v2435_v45 = vadd.high.f32.bf16 %v3423_v15, %v3252_v8  ;;  %v3450_v5 = vsel %vm897_vm12, %v1741_v34, -inf  ;;  %v1742_v2 = vmax.f32 %v2434_v37, 0.0  ;;  %v2438_v22 = vadd.low.f32.bf16 %v549_v10, %v3315_v40 }
 0x155   :  { %v3413_v20 = vpop.f32.mrf.mxu0  ;;  %v3454_v24 = vsel %vm897_vm12, %v1225_v51, -inf  ;;  %v3457_v57 = vsel %vm897_vm12, %v1744_v30, -inf  ;;  %v555_v62 = vadd.f32 %v3369_v31, %v3355_v0  ;;  %v3465_v32 = vsel %vm897_vm12, %v871_v50, -inf }
 0x156   :  { %3986 = vst [vmem:[#allocation20_spill] sm:$0xff] %v3457_v57  ;;  %v874_v36 = vmax.f32 %v2435_v45, 0.0  ;;  %v3468_v33 = vsel %vm897_vm12, %v1228_v61, -inf  ;;  %v3471_v40 = vsel %vm897_vm12, %v1747_v29, -inf  ;;  %v869_v10 = vmax.f32 %v2436_v9, 0.0 }
 0x157   :  { %v3431_v1 = vpop.f32.mrf.mxu0  ;;  %v1226_v63 = vmax.f32 %v2437_v35, 0.0  ;;  %v2439_v34 = vadd.high.f32.bf16 %v3367_v60, %v3270_v41  ;;  %v3477_v37 = vsel %vm897_vm12, %v1742_v2, -inf  ;;  %v1745_v25 = vmax.f32 %v2438_v22, 0.0 }
 0x158   :  { %v935_v31 = vsel %vm897_vm12, %v874_v36, -inf  ;;  %v2440_v51 = vadd.low.f32.bf16 %v3383_v16, %v3270_v41  ;;  %v903_v29 = vmax.f32 %v3427_v44, %v3465_v32  ;;  %v2441_v61 = vadd.low.f32.bf16 %v555_v62, %v3254_v12 }
 0x159   :  { %v462_v4 = vpop.f32.mrf.mxu0  ;;  %v3481_v30 = vmax.f32 %v932_v49, %v935_v31  ;;  %v2442_v45 = vadd.high.f32.bf16 %v555_v62, %v3272_v7  ;;  %v553_v9 = vadd.f32 %v3355_v0, %v3377_v11  ;;  %v1259_v35 = vmax.f32 %v3434_v19, %v3468_v33 }
 0x15a   :  { %v1778_v41 = vmax.f32 %v3439_v46, %v3471_v40  ;;  %v2443_v49 = vadd.high.f32.bf16 %v3367_v60, %v3336_v55  ;;  %v3498_v2 = vadd.f32 %v3355_v0, %v462_v4  ;;  %v900_v44 = vsel %vm897_vm12, %v869_v10, -inf }
 0x15b   :  { %v3483_v50 = vpop.f32.mrf.mxu0  ;;  %v1256_v22 = vsel %vm897_vm12, %v1226_v63, -inf  ;;  %v1229_v36 = vmax.f32 %v2439_v34, 0.0  ;;  %v3504_v11 = vadd.f32 %v3385_v56, %v3355_v0  ;;  %v1775_v19 = vsel %vm897_vm12, %v1745_v25, -inf }
 0x15c   :  { %v1227_v32 = vmax.f32 %v2440_v51, 0.0  ;;  %v2444_v46 = vadd.low.f32.bf16 %v3383_v16, %v3336_v55  ;;  %v2445_v60 = vadd.high.f32.bf16 %v555_v62, %v3340_v38  ;;  %v875_v4 = vmax.f32 %v2441_v61, 0.0 }
 0x15d   :  { %v3510_v33 = vpop.f32.mrf.mxu0  ;;  %v1232_v40 = vmax.f32 %v2442_v45, 0.0  ;;  %v2446_v10 = vadd.low.f32.bf16 %v553_v9, %v3252_v8  ;;  %v2447_v63 = vadd.low.f32.bf16 %v553_v9, %v3272_v7  ;;  %v901_v34 = vmax.f32 %v3442_v26, %v900_v44 }
 0x15e   :  { %v1748_v56 = vmax.f32 %v2443_v49, 0.0  ;;  %v2448_v31 = vadd.low.f32.bf16 %v553_v9, %v3340_v38  ;;  %v2449_v25 = vadd.high.f32.bf16 %v3498_v2, %v3256_v14  ;;  %v1257_v55 = vmax.f32 %v3447_v23, %v1256_v22 }
 0x15f   :  { %v1776_v16 = vmax.f32 %v3450_v5, %v1775_v19  ;;  %v1289_v62 = vsel %vm897_vm12, %v1229_v36, -inf  ;;  %v2450_v51 = vadd.high.f32.bf16 %v3504_v11, %v3254_v12  ;;  %v1287_v8 = vsel %vm897_vm12, %v1227_v32, -inf  ;;  %v3524_v45 = vpop.f32.mrf.mxu0 }
 0x160   :  { %v1746_v7 = vmax.f32 %v2444_v46, 0.0  ;;  %v1751_v61 = vmax.f32 %v2445_v60, 0.0  ;;  %v878_v26 = vmax.f32 %v2449_v25, 0.0  ;;  %v906_v38 = vsel %vm897_vm12, %v875_v4, -inf }
 0x161   :  { %v1262_v9 = vsel %vm897_vm12, %v1232_v40, -inf  ;;  %v873_v49 = vmax.f32 %v2446_v10, 0.0  ;;  %v1230_v23 = vmax.f32 %v2447_v63, 0.0  ;;  %v1749_v44 = vmax.f32 %v2448_v31, 0.0  ;;  %v478_v10 = vpop.f32.mrf.mxu0 }
 0x162   :  { %v2451_v5 = vadd.high.f32.bf16 %v3504_v11, %v3274_v17  ;;  %v2452_v12 = vadd.low.f32.bf16 %v3423_v15, %v3274_v17  ;;  %v3533_v22 = vsel %vm897_vm12, %v878_v26, -inf  ;;  %v1290_v36 = vmax.f32 %v3454_v24, %v1289_v62 }
 0x163   :  { %v876_v19 = vmax.f32 %v2450_v51, 0.0  ;;  %v559_v32 = vadd.f32 %v3403_v28, %v3355_v0  ;;  %v940_v46 = vmax.f32 %v3481_v30, %v3533_v22  ;;  %v3541_v60 = vsel %vm897_vm12, %v1748_v56, -inf }
 0x164   :  { %3987 = vst [vmem:[#allocation21_spill] sm:$0xff] %v3541_v60  ;;  %v1288_v4 = vmax.f32 %v3462_v18, %v1287_v8  ;;  %v3545_v40 = vsel %vm897_vm12, %v1746_v7, -inf  ;;  %v557_v17 = vadd.f32 %v3355_v0, %v3413_v20  ;;  %v3549_v24 = vmax.f32 %v903_v29, %v906_v38 }
 0x165   :  { %v3551_v63 = vmax.f32 %v1259_v35, %v1262_v9  ;;  %v1781_v28 = vsel %vm897_vm12, %v1751_v61, -inf  ;;  %v904_v30 = vsel %vm897_vm12, %v873_v49, -inf  ;;  %v1260_v56 = vsel %vm897_vm12, %v1230_v23, -inf }
 0x166   :  { %v1779_v31 = vsel %vm897_vm12, %v1749_v44, -inf  ;;  %v1233_v18 = vmax.f32 %v2451_v5, 0.0  ;;  %v1231_v25 = vmax.f32 %v2452_v12, 0.0  ;;  %v937_v62 = vsel %vm897_vm12, %v876_v19, -inf }
 0x167   :  { %v2453_v51 = vadd.low.f32.bf16 %v559_v32, %v3258_v52  ;;  %v2454_v20 = vadd.high.f32.bf16 %v559_v32, %v3276_v6  ;;  %v3561_v29 = vadd.f32 %v3355_v0, %v478_v10  ;;  %v3563_v35 = vmax.f32 %v1778_v41, %v1781_v28 }
 0x168   :  { %v3565_v8 = vmax.f32 %v901_v34, %v904_v30  ;;  %v2455_v7 = vadd.high.f32.bf16 %v3504_v11, %v3342_v42  ;;  %v2456_v61 = vadd.low.f32.bf16 %v557_v17, %v3256_v14  ;;  %v3570_v26 = vmax.f32 %v1257_v55, %v1260_v56 }
 0x169   :  { %v3572_v38 = vmax.f32 %v1776_v16, %v1779_v31  ;;  %v2457_v9 = vadd.low.f32.bf16 %v3423_v15, %v3342_v42  ;;  %v3578_v49 = vadd.f32 %v3431_v1, %v3355_v0  ;;  %v3988_v41 = vmax.f32 %v3388_v21, %v3391_v59  ;;  %v2085_v31 = vpop.f32.mrf.mxu1 }
 0x16a   :  { %v1293_v11 = vsel %vm897_vm12, %v1233_v18, -inf  ;;  %v1291_v14 = vsel %vm897_vm12, %v1231_v25, -inf  ;;  %v2458_v55 = vadd.high.f32.bf16 %v559_v32, %v3344_v54  ;;  %v879_v16 = vmax.f32 %v2453_v51, 0.0 }
 0x16b   :  { %v3583_v34 = vmax.f32 %v3988_v41, %v937_v62  ;;  %v1236_v23 = vmax.f32 %v2454_v20, 0.0  ;;  %v2459_v44 = vadd.low.f32.bf16 %v557_v17, %v3276_v6  ;;  %v2460_v42 = vadd.high.f32.bf16 %v3561_v29, %v3260_v53 }
 0x16c   :  { %v3591_v15 = vmax.f32 %v2455_v7, 0.0  ;;  %v877_v1 = vmax.f32 %v2456_v61, 0.0  ;;  %v2461_v21 = vadd.low.f32.bf16 %v557_v17, %v3344_v54  ;;  %v3596_v59 = vadd.f32 %v3483_v50, %v3355_v0 }
 0x16d   :  { %v3598_v5 = vmax.f32 %v1290_v36, %v1293_v11  ;;  %v3600_v12 = vmax.f32 %v1288_v4, %v1291_v14  ;;  %v3602_v22 = vmax.f32 %v2457_v9, 0.0  ;;  %v2462_v6 = vadd.high.f32.bf16 %v3578_v49, %v3258_v52 }
 0x16e   :  { %3989 = vst [vmem:[#allocation22_spill] sm:$0xff] %v3591_v15  ;;  %v1755_v19 = vmax.f32 %v2458_v55, 0.0  ;;  %v2463_v32 = vadd.high.f32.bf16 %v3578_v49, %v3278_v43  ;;  %v561_v54 = vadd.f32 %v3355_v0, %v3510_v33  ;;  %v882_v17 = vmax.f32 %v2460_v42, 0.0  ;;  %v507_v55 = vpop.f32.mrf.mxu1 }
 0x16f   :  { %v910_v50 = vsel %vm897_vm12, %v879_v16, -inf  ;;  %v1266_v36 = vsel %vm897_vm12, %v1236_v23, -inf  ;;  %v1234_v10 = vmax.f32 %v2459_v44, 0.0  ;;  %v2464_v4 = vadd.low.f32.bf16 %v3498_v2, %v3278_v43  ;;  %v2081_v16 = vpop.f32.mrf.mxu0 }
 0x170   :  { %v908_v28 = vsel %vm897_vm12, %v877_v1, -inf  ;;  %v1753_v30 = vmax.f32 %v2461_v21, 0.0  ;;  %v2465_v52 = vadd.low.f32.bf16 %v3596_v59, %v3262_v58  ;;  %v943_v56 = vsel %vm897_vm12, %v882_v17, -inf }
 0x171   :  { %v880_v18 = vmax.f32 %v2462_v6, 0.0  ;;  %v2466_v33 = vadd.high.f32.bf16 %v3596_v59, %v3280_v48  ;;  %v3622_v25 = vadd.f32 %v3524_v45, %v3355_v0  ;;  %v3624_v62 = vmax.f32 %v940_v46, %v943_v56 }
 0x172   :  { %v911_v43 = vmax.f32 %v3549_v24, %v910_v50  ;;  %v3628_v51 = vsel %vm897_vm12, %v1755_v19, -inf  ;;  %v1237_v20 = vmax.f32 %v2463_v32, 0.0  ;;  %v2467_v7 = vadd.low.f32.bf16 %v561_v54, %v3260_v53  ;;  %v2086_v50 = vpop.f32.mrf.mxu1 }
 0x173   :  { %v1267_v61 = vmax.f32 %v3551_v63, %v1266_v36  ;;  %v1264_v9 = vsel %vm897_vm12, %v1234_v10, -inf  ;;  %v1235_v41 = vmax.f32 %v2464_v4, 0.0  ;;  %v2468_v11 = vadd.low.f32.bf16 %v561_v54, %v3280_v48  ;;  %v491_v36 = vpop.f32.mrf.mxu0 }
 0x174   :  { %v909_v45 = vmax.f32 %v3565_v8, %v908_v28  ;;  %v3636_v46 = vsel %vm897_vm12, %v1753_v30, -inf  ;;  %v883_v14 = vmax.f32 %v2465_v52, 0.0  ;;  %v941_v53 = vsel %vm897_vm12, %v880_v18, -inf }
 0x175   :  { %v1240_v23 = vmax.f32 %v2466_v33, 0.0  ;;  %v2470_v63 = vadd.low.f32.bf16 %v561_v54, %v3348_v3  ;;  %v2471_v44 = vadd.high.f32.bf16 %v3622_v25, %v3262_v58  ;;  %v1265_v48 = vmax.f32 %v3570_v26, %v1264_v9  ;;  %v2082_v9 = vpop.f32.mrf.mxu0 }
 0x176   :  { %v1297_v8 = vsel %vm897_vm12, %v1237_v20, -inf  ;;  %v881_v42 = vmax.f32 %v2467_v7, 0.0  ;;  %v2472_v1 = vadd.high.f32.bf16 %v3622_v25, %v3282_v13  ;;  %v1295_v21 = vsel %vm897_vm12, %v1235_v41, -inf  ;;  %v510_v20 = vpop.f32.mrf.mxu1 }
 0x177   :  { %v2473_v6 = vadd.high.f32.bf16 %v3596_v59, %v3348_v3  ;;  %v1238_v19 = vmax.f32 %v2468_v11, 0.0  ;;  %v2474_v32 = vadd.low.f32.bf16 %v3561_v29, %v3282_v13  ;;  %v942_v26 = vmax.f32 %v3583_v34, %v941_v53 }
 0x178   :  { %v914_v54 = vsel %vm897_vm12, %v883_v14, -inf  ;;  %v3658_v17 = vadd.f32 %v2085_v31, %v3355_v0  ;;  %v1298_v10 = vmax.f32 %v3598_v5, %v1297_v8  ;;  %v1270_v3 = vsel %vm897_vm12, %v1240_v23, -inf }
 0x179   :  { %v1757_v59 = vmax.f32 %v2470_v63, 0.0  ;;  %v884_v4 = vmax.f32 %v2471_v44, 0.0  ;;  %v1296_v13 = vmax.f32 %v3600_v12, %v1295_v21  ;;  %v912_v28 = vsel %vm897_vm12, %v881_v42, -inf  ;;  %v3993_v42 = vld [vmem:[#allocation9_spill] sm:$0xff] }
 0x17a   :  { %v1241_v30 = vmax.f32 %v2472_v1, 0.0  ;;  %v3665_v34 = vadd.f32 %v3355_v0, %v507_v55  ;;  %v3667_v52 = vmax.f32 %v911_v43, %v914_v54  ;;  %v3669_v56 = vmax.f32 %v2473_v6, 0.0  ;;  %v3994_v1 = vld [vmem:[#allocation7_spill] sm:$0xff]  ;;  %v494_v6 = vpop.f32.mrf.mxu0 }
 0x17b   :  { %v1268_v31 = vsel %vm897_vm12, %v1238_v19, -inf  ;;  %v1239_v18 = vmax.f32 %v2474_v32, 0.0  ;;  %v3672_v5 = vmax.f32 %v1267_v61, %v1270_v3  ;;  %v2475_v33 = vadd.high.f32.bf16 %v3658_v17, %v3303_v27  ;;  %v2089_v3 = vpop.f32.mrf.mxu1 }
 0x17c   :  { %v3677_v12 = vadd.f32 %v2086_v50, %v3355_v0  ;;  %v3680_v7 = vadd.f32 %v2081_v16, %v3355_v0  ;;  %v3682_v43 = vmax.f32 %v909_v45, %v912_v28  ;;  %v3685_v41 = vsel %vm897_vm12, %v1757_v59, -inf  ;;  %v3996_v50 = vld [vmem:[#allocation2_spill] sm:$0xff] }
 0x17d   :  { %v945_v11 = vsel %vm897_vm12, %v884_v4, -inf  ;;  %v2476_v61 = vadd.high.f32.bf16 %v3658_v17, %v3288_v47  ;;  %v3690_v14 = vmax.f32 %v1265_v48, %v1268_v31  ;;  %v1301_v55 = vsel %vm897_vm12, %v1241_v30, -inf  ;;  %v3997_v31 = vld [vmem:[#allocation8_spill] sm:$0xff] }
 0x17e   :  { %3990 = vst [vmem:[#allocation23_spill] sm:$0xff] %v3677_v12  ;;  %v2477_v53 = vadd.low.f32.bf16 %v3665_v34, %v3303_v27  ;;  %v3696_v16 = vadd.f32 %v3355_v0, %v491_v36  ;;  %v1299_v45 = vsel %vm897_vm12, %v1239_v18, -inf  ;;  %v2478_v23 = vadd.low.f32.bf16 %v3665_v34, %v3288_v47  ;;  %v3995_v47 = vld [vmem:[#allocation3_spill] sm:$0xff] }
 0x17f   :  { %v3702_v63 = vadd.f32 %v3355_v0, %v510_v20  ;;  %v3705_v44 = vadd.f32 %v2082_v9, %v3355_v0  ;;  %v3707_v48 = vmax.f32 %v942_v26, %v945_v11  ;;  %v891_v8 = vmax.f32 %v2475_v33, 0.0 }
 0x180   :  { %v2479_v27 = vadd.high.f32.bf16 %v3677_v12, %v3993_v42  ;;  %v2480_v21 = vadd.high.f32.bf16 %v3680_v7, %v3994_v1  ;;  %v3713_v19 = vmax.f32 %v1298_v10, %v1301_v55  ;;  %v1248_v32 = vmax.f32 %v2476_v61, 0.0 }
 0x181   :  { %3991 = vst [vmem:[#allocation24_spill] sm:$0xff] %v3702_v63  ;;  %3992 = vst [vmem:[#allocation25_spill] sm:$0xff] %v3705_v44  ;;  %v2481_v54 = vadd.high.f32.bf16 %v3677_v12, %v3995_v47  ;;  %v2482_v36 = vadd.high.f32.bf16 %v3680_v7, %v3996_v50  ;;  %v3719_v26 = vmax.f32 %v1296_v13, %v1299_v45  ;;  %v889_v59 = vmax.f32 %v2477_v53, 0.0 }
 0x182   :  { %v2483_v4 = vadd.low.f32.bf16 %v3696_v16, %v3994_v1  ;;  %v2484_v28 = vadd.low.f32.bf16 %v3696_v16, %v3996_v50  ;;  %v1246_v30 = vmax.f32 %v2478_v23, 0.0  ;;  %v2485_v10 = vadd.low.f32.bf16 %v3702_v63, %v3993_v42 }
 0x183   :  { %v2486_v18 = vadd.high.f32.bf16 %v3705_v44, %v3997_v31  ;;  %v3730_v33 = vadd.f32 %v3355_v0, %v494_v6  ;;  %v922_v13 = vsel %vm897_vm12, %v891_v8, -inf  ;;  %v892_v20 = vmax.f32 %v2479_v27, 0.0  ;;  %v3998_v6 = vld [vmem:[#allocation4_spill] sm:$0xff]  ;;  %v523_v8 = vpop.f32.mrf.mxu1 }
 0x184   :  { %v887_v9 = vmax.f32 %v2480_v21, 0.0  ;;  %v3734_v11 = vadd.f32 %v2089_v3, %v3355_v0  ;;  %v1278_v61 = vsel %vm897_vm12, %v1248_v32, -inf  ;;  %v1249_v55 = vmax.f32 %v2481_v54, 0.0 }
 0x185   :  { %v2487_v53 = vadd.low.f32.bf16 %v3702_v63, %v3995_v47  ;;  %v1244_v45 = vmax.f32 %v2482_v36, 0.0  ;;  %v920_v23 = vsel %vm897_vm12, %v889_v59, -inf  ;;  %v885_v42 = vmax.f32 %v2483_v4, 0.0  ;;  %v3999_v59 = vld [vmem:[#allocation10_spill] sm:$0xff]  ;;  %v2090_v12 = vpop.f32.mrf.mxu1 }
 0x186   :  { %v1242_v1 = vmax.f32 %v2484_v28, 0.0  ;;  %v2488_v50 = vadd.high.f32.bf16 %v3705_v44, %v3998_v6  ;;  %v1276_v27 = vsel %vm897_vm12, %v1246_v30, -inf  ;;  %v890_v21 = vmax.f32 %v2485_v10, 0.0  ;;  %v4000_v10 = vld [vmem:[#allocation5_spill] sm:$0xff] }
 0x187   :  { %v888_v3 = vmax.f32 %v2486_v18, 0.0  ;;  %v2489_v32 = vadd.low.f32.bf16 %v3730_v33, %v3997_v31  ;;  %v953_v54 = vsel %vm897_vm12, %v892_v20, -inf  ;;  %v918_v47 = vsel %vm897_vm12, %v887_v9, -inf  ;;  %v4001_v31 = vld [vmem:[#allocation14_spill] sm:$0xff] }
 0x188   :  { %v2490_v36 = vadd.low.f32.bf16 %v3730_v33, %v3998_v6  ;;  %v2491_v4 = vadd.high.f32.bf16 %v3734_v11, %v3999_v59  ;;  %v3752_v28 = vsel %vm897_vm12, %v1249_v55, -inf  ;;  %v1247_v58 = vmax.f32 %v2487_v53, 0.0 }
 0x189   :  { %v1274_v30 = vsel %vm897_vm12, %v1244_v45, -inf  ;;  %v2492_v18 = vadd.high.f32.bf16 %v3734_v11, %v4000_v10  ;;  %v916_v9 = vsel %vm897_vm12, %v885_v42, -inf  ;;  %v1272_v24 = vsel %vm897_vm12, %v1242_v1, -inf }
 0x18a   :  { %v1245_v6 = vmax.f32 %v2488_v50, 0.0  ;;  %v951_v63 = vsel %vm897_vm12, %v890_v21, -inf  ;;  %v919_v55 = vmax.f32 %v3667_v52, %v918_v47  ;;  %v949_v53 = vsel %vm897_vm12, %v888_v3, -inf  ;;  %v4003_v47 = vld [vmem:[#allocation12_spill] sm:$0xff] }
 0x18b   :  { %v886_v44 = vmax.f32 %v2489_v32, 0.0  ;;  %v1275_v45 = vmax.f32 %v3672_v5, %v1274_v30  ;;  %v1243_v15 = vmax.f32 %v2490_v36, 0.0  ;;  %v895_v57 = vmax.f32 %v2491_v4, 0.0 }
 0x18c   :  { %v3766_v60 = vadd.f32 %v3355_v0, %v523_v8  ;;  %v917_v42 = vmax.f32 %v3682_v43, %v916_v9  ;;  %v1273_v1 = vmax.f32 %v3690_v14, %v1272_v24  ;;  %v1252_v50 = vmax.f32 %v2492_v18, 0.0  ;;  %v526_v8 = vpop.f32.mrf.mxu1  ;;  %v4004_v14 = vld [vmem:[#allocation6_spill] sm:$0xff] }
 0x18d   :  { %v3771_v20 = vadd.f32 %v2090_v12, %v3355_v0  ;;  %v950_v52 = vmax.f32 %v3707_v48, %v949_v53  ;;  %v1305_v21 = vsel %vm897_vm12, %v1245_v6, -inf  ;;  %v947_v32 = vsel %vm897_vm12, %v886_v44, -inf }
 0x18e   :  { %v2494_v5 = vadd.low.f32.bf16 %v3766_v60, %v3999_v59  ;;  %v2495_v3 = vadd.low.f32.bf16 %v3766_v60, %v4000_v10  ;;  %v923_v43 = vmax.f32 %v919_v55, %v922_v13  ;;  %v1303_v48 = vsel %vm897_vm12, %v1243_v15, -inf }
 0x18f   :  { %4002 = vst [vmem:[#allocation9_spill] sm:$0xff] %v3771_v20  ;;  %v2496_v24 = vadd.high.f32.bf16 %v3771_v20, %v4003_v47  ;;  %v2497_v12 = vadd.high.f32.bf16 %v3771_v20, %v4004_v14  ;;  %v926_v36 = vsel %vm897_vm12, %v895_v57, -inf  ;;  %v1282_v59 = vsel %vm897_vm12, %v1252_v50, -inf }
 0x190   :  { %v893_v4 = vmax.f32 %v2494_v5, 0.0  ;;  %v1250_v30 = vmax.f32 %v2495_v3, 0.0  ;;  %v921_v18 = vmax.f32 %v917_v42, %v920_v23  ;;  %v1277_v10 = vmax.f32 %v1273_v1, %v1276_v27 }
 0x191   :  { %v3788_v9 = vadd.f32 %v3355_v0, %v526_v8  ;;  %v896_v6 = vmax.f32 %v2496_v24, 0.0  ;;  %v1253_v55 = vmax.f32 %v2497_v12, 0.0  ;;  %v948_v53 = vmax.f32 %v3624_v62, %v947_v32  ;;  %v4005_v24 = vld [vmem:[#allocation16_spill] sm:$0xff] }
 0x192   :  { %v924_v44 = vsel %vm897_vm12, %v893_v4, -inf  ;;  %v1280_v13 = vsel %vm897_vm12, %v1250_v30, -inf  ;;  %v1279_v15 = vmax.f32 %v1275_v45, %v1278_v61  ;;  %v2498_v5 = vadd.low.f32.bf16 %v3696_v16, %v4001_v31 }
 0x193   :  { %v925_v20 = vmax.f32 %v921_v18, %v924_v44  ;;  %v1281_v57 = vmax.f32 %v1277_v10, %v1280_v13  ;;  %v1306_v23 = vmax.f32 %v3713_v19, %v1305_v21  ;;  %v1304_v27 = vmax.f32 %v3719_v26, %v1303_v48 }
 0x194   :  { %v2499_v0 = vadd.low.f32.bf16 %v3788_v9, %v4003_v47  ;;  %v1307_v42 = vsel %vm897_vm12, %v1247_v58, -inf  ;;  %v927_v1 = vmax.f32 %v923_v43, %v926_v36  ;;  %v1283_v50 = vmax.f32 %v1279_v15, %v1282_v59  ;;  %v4008_v59 = vld [vmem:[#allocation13_spill] sm:$0xff]  ;;  %v4011_v15 = vld [vmem:[#allocation15_spill] sm:$0xff] }
 0x195   :  { %v2500_v62 = vadd.low.f32.bf16 %v3788_v9, %v4004_v14  ;;  %v954_v61 = vmax.f32 %v950_v52, %v953_v54  ;;  %v957_v45 = vsel %vm897_vm12, %v896_v6, -inf  ;;  %v1313_v3 = vsel %vm897_vm12, %v1253_v55, -inf }
 0x196   :  { %v894_v16 = vmax.f32 %v2499_v0, 0.0  ;;  %v952_v8 = vmax.f32 %v948_v53, %v951_v63  ;;  %v1284_v21 = vmax.f32 %v1281_v57, %v1283_v50  ;;  %v928_v26 = vmax.f32 %v925_v20, %v927_v1  ;;  %v4007_v20 = vld [vmem:[#allocation18_spill] sm:$0xff]  ;;  %v4014_v0 = vld [vmem:[#allocation20_spill] sm:$0xff] }
 0x197   :  { %v1251_v19 = vmax.f32 %v2500_v62, 0.0  ;;  %v1761_v32 = vmax.f32 %v2498_v5, 0.0  ;;  %v1310_v47 = vmax.f32 %v1306_v23, %v3752_v28  ;;  %v1308_v43 = vmax.f32 %v1304_v27, %v1307_v42  ;;  %v4013_v27 = vld [vmem:[#allocation21_spill] sm:$0xff]  ;;  %v4015_v1 = vld [vmem:[#allocation22_spill] sm:$0xff] }
 0x198   :  { %v955_v58 = vsel %vm897_vm12, %v894_v16, -inf  ;;  %v2501_v12 = vadd.low.f32.bf16 %v3665_v34, %v4005_v24  ;;  %v958_v14 = vmax.f32 %v954_v61, %v957_v45  ;;  %2103 = vmatprep.mubr.msk.f32.mxu1 %vm897_vm12, %v1284_v21  ;;  %v4006_v63 = vadd.high.f32.bf16 %v3680_v7, %v4001_v31  ;;  %v4016_v62 = vld [vmem:[#allocation25_spill] sm:$0xff]  ;;  %v962_v45 = vld [vmem:[%s3926_s4 + $0x10] sm:$0xff] }
 0x199   :  { %v956_v54 = vmax.f32 %v952_v8, %v955_v58  ;;  %v1311_v52 = vsel %vm897_vm12, %v1251_v19, -inf  ;;  %v2502_v36 = vadd.low.f32.bf16 %v3766_v60, %v4007_v20  ;;  %v1314_v28 = vmax.f32 %v1310_v47, %v1313_v3 }
 0x19a   :  { %v1763_v48 = vmax.f32 %v4006_v63, 0.0  ;;  %v1312_v4 = vmax.f32 %v1308_v43, %v1311_v52  ;;  %v2503_v30 = vadd.low.f32.bf16 %v3498_v2, %v3346_v39  ;;  %v1789_v34 = vsel %vm897_vm12, %v3669_v56, -inf  ;;  %v4017_v43 = vld [vmem:[#allocation17_spill] sm:$0xff] }
 0x19b   :  { %v2504_v18 = vadd.low.f32.bf16 %v3561_v29, %v4008_v59  ;;  %v3821_v10 = vmax.f32 %v956_v54, %v958_v14  ;;  %v2505_v7 = vadd.high.f32.bf16 %v3658_v17, %v4005_v24  ;;  %v1791_v31 = vsel %vm897_vm12, %v1761_v32, -inf  ;;  %v961_v32 = vld [vmem:[%s3926_s4 + $0x8] sm:$0xff]  ;;  %v4018_v24 = vld [vmem:[#allocation24_spill] sm:$0xff] }
 0x19c   :  { %v2506_v60 = vadd.high.f32.bf16 %v3734_v11, %v4007_v20  ;;  %v1315_v44 = vmax.f32 %v1312_v4, %v1314_v28  ;;  %v1810_v2 = vsel %vm897_vm12, %v3602_v22, -inf  ;;  %v1786_v56 = vmax.f32 %v3563_v35, %v3628_v51  ;;  %v964_v11 = vld [vmem:[%s3926_s4 + $0x20] sm:$0xff] }
 0x19d   :  { %v4009_v29 = vadd.high.f32.bf16 %v3578_v49, %v3346_v39  ;;  %v4010_v17 = vmax.f32 %v3572_v38, %v3636_v46  ;;  %v2507_v55 = vadd.high.f32.bf16 %v3622_v25, %v4008_v59  ;;  %v1765_v22 = vmax.f32 %v2501_v12, 0.0  ;;  %v4012_v46 = vld [vmem:[#allocation11_spill] sm:$0xff]  ;;  %v963_v25 = vld [vmem:[%s3926_s4 + $0x18] sm:$0xff] }
 0x19e   :  { %v1793_v53 = vsel %vm897_vm12, %v1763_v48, -inf  ;;  %v1769_v35 = vmax.f32 %v2502_v36, 0.0  ;;  %2104 = vmatmul.mubr.msk.f32.vlgmr.msra.gmra.mxu1 %vm897_vm12, %v1315_v44  ;;  %v1754_v39 = vmax.f32 %v2503_v30, 0.0  ;;  %v1790_v49 = vmax.f32 %v1786_v56, %v1789_v34  ;;  %v4019_v48 = vld [vmem:[#allocation19_spill] sm:$0xff]  ;;  %v960_v36 = vld [vmem:[%s3926_s4] sm:$0xff] }
 0x19f   :  { %v1756_v13 = vmax.f32 %v4009_v29, 0.0  ;;  %v1788_v6 = vmax.f32 %v4010_v17, %v3685_v41  ;;  %v2508_v38 = vadd.low.f32.bf16 %v3730_v33, %v4011_v15  ;;  %2107 = vmatpush3.msra.mxu1 %v4012_v46  ;;  %2118 = vmatprep.mubr.msk.f32.mxu1 %vm897_vm12, %v928_v26  ;;  %v1807_v41 = vmax.f32 %v3477_v37, %v3545_v40  ;;  %v4020_v34 = vld [vmem:[#allocation23_spill] sm:$0xff] }
 0x1a0   :  { %v1758_v57 = vmax.f32 %v2504_v18, 0.0  ;;  %v1767_v5 = vmax.f32 %v2505_v7, 0.0  ;;  %v1771_v23 = vmax.f32 %v2506_v60, 0.0  ;;  %2108 = vmatprep.subr.mxu1 %v964_v11  ;;  %v1809_v42 = vmax.f32 %v4014_v0, %v4013_v27 }
 0x1a1   :  { %v1792_v51 = vmax.f32 %v1788_v6, %v1791_v31  ;;  %v1812_v33 = vsel %vm897_vm12, %v4015_v1, -inf  ;;  %v1794_v50 = vmax.f32 %v1790_v49, %v1793_v53  ;;  %v2509_v61 = vadd.high.f32.bf16 %v4016_v62, %v4011_v15  ;;  %2109 = vmatpush3.msra.mxu1 %v964_v11  ;;  %v4021_v31 = vld [vmem:[#allocation9_spill] sm:$0xff]  ;;  %v1996_v6 = vld [vmem:[%s3926_s4 + $0x80] sm:$0xff] }
 0x1a2   :  { %v1811_v37 = vmax.f32 %v1807_v41, %v1810_v2  ;;  %v1760_v40 = vmax.f32 %v2507_v55, 0.0  ;;  %v1795_v3 = vsel %vm897_vm12, %v1765_v22, -inf  ;;  %v1799_v16 = vsel %vm897_vm12, %v1769_v35, -inf  ;;  %2110 = vmatprep.subr.mxu1 %v963_v25  ;;  %v1995_v35 = vld [vmem:[%s3926_s4 + $0x78] sm:$0xff] }
 0x1a3   :  { %v1816_v8 = vsel %vm897_vm12, %v1756_v13, -inf  ;;  %v1814_v19 = vsel %vm897_vm12, %v1754_v39, -inf  ;;  %v1762_v21 = vmax.f32 %v2508_v38, 0.0  ;;  %v1796_v26 = vmax.f32 %v1792_v51, %v1795_v3  ;;  %2111 = vmatpush3.msra.mxu1 %v963_v25  ;;  %v1993_v25 = vld [vmem:[%s3926_s4 + $0x68] sm:$0xff] }
 0x1a4   :  { %v1818_v47 = vsel %vm897_vm12, %v1758_v57, -inf  ;;  %v1797_v58 = vsel %vm897_vm12, %v1767_v5, -inf  ;;  %v2510_v12 = vadd.low.f32.bf16 %v4018_v24, %v4017_v43  ;;  %v1801_v14 = vsel %vm897_vm12, %v1771_v23, -inf  ;;  %2112 = vmatprep.subr.mxu1 %v962_v45  ;;  %v1992_v5 = vld [vmem:[%s3926_s4 + $0x60] sm:$0xff] }
 0x1a5   :  { %v1764_v54 = vmax.f32 %v2509_v61, 0.0  ;;  %v1798_v52 = vmax.f32 %v1794_v50, %v1797_v58  ;;  %v1800_v63 = vmax.f32 %v1796_v26, %v1799_v16  ;;  %v2511_v20 = vadd.low.f32.bf16 %v3788_v9, %v4019_v48  ;;  %2113 = vmatpush3.msra.mxu1 %v962_v45  ;;  %v1997_v9 = vld [vmem:[%s3926_s4 + $0x88] sm:$0xff]  ;;  %v2000_v61 = vld [vmem:[%s3928_s5] ss:$0 sm:$0xff] }
 0x1a6   :  { %v1813_v28 = vmax.f32 %v1809_v42, %v1812_v33  ;;  %v1815_v4 = vmax.f32 %v1811_v37, %v1814_v19  ;;  %v1820_v30 = vsel %vm897_vm12, %v1760_v40, -inf  ;;  %2114 = vmatprep.subr.mxu1 %v961_v32  ;;  %v2512_v59 = vadd.high.f32.bf16 %v4020_v34, %v4017_v43 }
 0x1a7   :  { %v1822_v18 = vsel %vm897_vm12, %v1762_v21, -inf  ;;  %v1802_v7 = vmax.f32 %v1798_v52, %v1801_v14  ;;  %v2513_v60 = vadd.high.f32.bf16 %v4021_v31, %v4019_v48  ;;  %2115 = vmatpush3.msra.mxu1 %v961_v32  ;;  %v1766_v56 = vmax.f32 %v2510_v12, 0.0 }
 0x1a8   :  { %v1817_v44 = vmax.f32 %v1813_v28, %v1816_v8  ;;  %v1819_v2 = vmax.f32 %v1815_v4, %v1818_v47  ;;  %2116 = vmatprep.subr.mxu1 %v960_v36  ;;  %v1824_v29 = vsel %vm897_vm12, %v1764_v54, -inf  ;;  %v1770_v13 = vmax.f32 %v2511_v20, 0.0 }
 0x1a9   :  { %2117 = vmatpush3.msra.mxu1 %v960_v36  ;;  %v1803_v17 = vmax.f32 %v1800_v63, %v1802_v7  ;;  %v1768_v22 = vmax.f32 %v2512_v59, 0.0  ;;  %v1772_v53 = vmax.f32 %v2513_v60, 0.0  ;;  %v1826_v49 = vsel %vm897_vm12, %v1766_v56, -inf }
 0x1aa   :  { %v1821_v11 = vmax.f32 %v1817_v44, %v1820_v30  ;;  %v1823_v55 = vmax.f32 %v1819_v2, %v1822_v18  ;;  %2119 = vmatmul.mubr.msk.f32.vlgmr.msra.gmra.mxu1 %vm897_vm12, %v3821_v10  ;;  %2121 = vmatprep.subr.mxu1 %v1997_v9  ;;  %v1830_v51 = vsel %vm897_vm12, %v1770_v13, -inf  ;;  %v1994_v10 = vld [vmem:[%s3926_s4 + $0x70] sm:$0xff] }
 0x1ab   :  { %2122 = vmatpush3.msra.mxu1 %v1997_v9  ;;  %2133 = vmatprep.mubr.msk.f32.mxu1 %vm897_vm12, %v1803_v17  ;;  %v1828_v38 = vsel %vm897_vm12, %v1768_v22, -inf  ;;  %v1832_v46 = vsel %vm897_vm12, %v1772_v53, -inf }
 0x1ac   :  { %v1825_v39 = vmax.f32 %v1821_v11, %v1824_v29  ;;  %2123 = vmatprep.subr.mxu1 %v1996_v6  ;;  %v1827_v15 = vmax.f32 %v1823_v55, %v1826_v49 }
 0x1ad   :  { %2124 = vmatpush3.msra.mxu1 %v1996_v6 }
 0x1ae   :  { %2125 = vmatprep.subr.mxu1 %v1995_v35  ;;  %v1829_v41 = vmax.f32 %v1825_v39, %v1828_v38  ;;  %v1831_v57 = vmax.f32 %v1827_v15, %v1830_v51 }
 0x1af   :  { %2126 = vmatpush3.msra.mxu1 %v1995_v35 }
 0x1b0   :  { %2127 = vmatprep.subr.mxu1 %v1994_v10  ;;  %v1833_v23 = vmax.f32 %v1829_v41, %v1832_v46 }
 0x1b1   :  { %2128 = vmatpush3.msra.mxu1 %v1994_v10 }
 0x1b2   :  { %2129 = vmatprep.subr.mxu1 %v1993_v25  ;;  %v1834_v27 = vmax.f32 %v1831_v57, %v1833_v23 }
 0x1b3   :  { %2130 = vmatpush3.msra.mxu1 %v1993_v25 }
 0x1b4   :  { %2131 = vmatprep.subr.mxu1 %v1992_v5 }
 0x1b5   :  { %2132 = vmatpush3.msra.mxu1 %v1992_v5 }
 0x1b6   :  { %2134 = vmatmul.mubr.msk.f32.vlgmr.msra.gmra.mxu1 %vm897_vm12, %v1834_v27 }
 0x25e   :  { %v2105_v0 = vpop.f32.mrf.mxu1 }
 0x260   :  { %v1395_v42 = vpop.f32.mrf.mxu1 }
 0x26a   :  { %v2120_v1 = vpop.f32.mrf.mxu1 }
 0x26b   :  { %v1482_v50 = vadd.f32 %v2120_v1, %v2105_v0 }
 0x26c   :  { %v1476_v33 = vpop.f32.mrf.mxu1 }
 0x26d   :  { %v1477_v45 = vadd.f32 %v1476_v33, %v1395_v42 }
 0x276   :  { %v2135_v62 = vpop.f32.mrf.mxu1 }
 0x277   :  { %v1924_v37 = vadd.f32 %v2135_v62, %v1482_v50 }
 0x278   :  { %v1914_v40 = vpop.f32.mrf.mxu1 }
 0x279   :  { %v1933_v3 = vadd.f32 %v2000_v61, %v1924_v37  ;;  %v1923_v16 = vadd.f32 %v1914_v40, %v1477_v45 }
 0x27b   :  { %1936 = vst.msk [vmem:[%s3929_s6 + $0x8] sm:$0xff] %vm1934_vm13, %v1933_v3  ;;  %v1932_v8 = vadd.f32 %v2000_v61, %v1923_v16 }
 0x27d   :  { %1935 = vst.msk [vmem:[%s3929_s6] sm:$0xff] %vm1934_vm13, %v1932_v8 }

</bundles_post_ra>
